<compile_context>
chip_gen: v6e
topology: v6e:2x2x1
jax: 0.10.0
libtpu: 0.0.40
codegen_flags: <defaults>
</compile_context>

<pallas_src>
import jax
import jax.numpy as jnp
from jax.experimental import pallas as pl
from jax.experimental.pallas import tpu as pltpu

AFFINE_EPS = 1e-4
_VMEM_LIMIT = 32 * 1024 * 1024  # safe on v5e/v6e/v7x; far above what these blocks need


# ----------------------------------------------------------------------------
# Pallas kernels (channels-major: per-image blocks are [C, HW], HW on the lane axis)
# ----------------------------------------------------------------------------
def make_trunk_kernel(n_inputs):
    """conv1x1(+folded ActNorm)+relu -> conv1x1(+ActNorm)+relu -> CBAM channel gate.

    Inputs: n_inputs activation slabs [Cx, HW] and matching w1 slabs [H, Cx], then
    b1 [H,1], w2 [H,H], b2 [H,1], CBAM MLP wa [r,H], ba [r,1], wb [H,r], bb [H,1].
    Outputs: hc [H, HW] (channel-gated hidden) and pooled [2, HW] (max/mean over
    channels) for the SpatialGate that runs in JAX glue.
    """

    def kernel(*refs):
        x_refs = refs[:n_inputs]
        w1_refs = refs[n_inputs:2 * n_inputs]
        (b1_ref, w2_ref, b2_ref, wa_ref, ba_ref, wb_ref, bb_ref,
         hc_ref, pooled_ref) = refs[2 * n_inputs:]

        # First 1x1 conv, accumulated per input slab (never materialize cat([z, ft])).
        h1 = b1_ref[...]                                               # [H,1] -> broadcast
        for x_ref, w_ref in zip(x_refs, w1_refs):
            h1 = h1 + jnp.dot(w_ref[...], x_ref[0],
                              preferred_element_type=jnp.float32)      # [H, HW]
        h1 = jnp.maximum(h1, 0.0)
        h2 = jnp.maximum(
            jnp.dot(w2_ref[...], h1, preferred_element_type=jnp.float32) + b2_ref[...],
            0.0)                                                       # [H, HW]

        # CBAM ChannelGate: global avg & max pool over spatial lanes + shared MLP (batched).
        avg_p = jnp.mean(h2, axis=1, keepdims=True)                    # [H, 1]
        max_p = jnp.max(h2, axis=1, keepdims=True)                     # [H, 1]
        p2 = jnp.concatenate([avg_p, max_p], axis=1)                   # [H, 2]
        hid = jnp.maximum(
            jnp.dot(wa_ref[...], p2, preferred_element_type=jnp.float32) + ba_ref[...], 0.0)
        o2 = jnp.dot(wb_ref[...], hid, preferred_element_type=jnp.float32) + bb_ref[...]
        att = jax.nn.sigmoid(jnp.sum(o2, axis=1, keepdims=True))       # [H, 1]
        hc = h2 * att                                                  # [H, HW]

        hc_ref[0] = hc.astype(hc_ref.dtype)
        # Channel pool for SpatialGate: row 0 = max over channels, row 1 = mean.
        pooled_ref[0] = jnp.concatenate(
            [jnp.max(hc, axis=0, keepdims=True),
             jnp.mean(hc, axis=0, keepdims=True)], axis=0).astype(pooled_ref.dtype)

    return kernel


def f_head_affine_kernel(hc_ref, g_ref, z_ref, wz_ref, bz_ref, zo_ref, ldp_ref):
    """Spatial-gate scaling, fused zero-conv head, sigmoid scale, affine apply, partial logdet."""
    cout = zo_ref.shape[1]
    h = hc_ref[0] * g_ref[0]                                           # [H,HW] * [1,HW]
    hz = jnp.dot(wz_ref[...], h, preferred_element_type=jnp.float32) + bz_ref[...]  # [2*Cout,HW]
    shift = hz[:cout]
    scale = jax.nn.sigmoid(hz[cout:] + 2.0) + AFFINE_EPS               # [Cout, HW]
    zo_ref[0] = ((z_ref[0] + shift) * scale).astype(zo_ref.dtype)
    # lane-dense per-image partial logdet; final reduce over HW happens in JAX
    ldp_ref[0] = jnp.sum(jnp.log(scale), axis=0, keepdims=True).astype(ldp_ref.dtype)


# ----------------------------------------------------------------------------
# pallas_call wrappers
# ----------------------------------------------------------------------------
def _full_spec(a):
    nd = a.ndim
    return pl.BlockSpec(a.shape, lambda n, _nd=nd: (0,) * _nd)


def run_trunk(x_list, p):
    n_in = len(x_list)
    N, _, HW = x_list[0].shape
    H = p['w2'].shape[0]
    in_specs = (
        [pl.BlockSpec((1, x.shape[1], HW), lambda n: (n, 0, 0)) for x in x_list]
        + [_full_spec(w) for w in p['w1']]
        + [_full_spec(p[k]) for k in ('b1', 'w2', 'b2', 'wa', 'ba', 'wb', 'bb')]
    )
    hc, pooled = pl.pallas_call(
        make_trunk_kernel(n_in),
        out_shape=(jax.ShapeDtypeStruct((N, H, HW), jnp.float32),
                   jax.ShapeDtypeStruct((N, 2, HW), jnp.float32)),
        grid=(N,),
        in_specs=in_specs,
        out_specs=(pl.BlockSpec((1, H, HW), lambda n: (n, 0, 0)),
                   pl.BlockSpec((1, 2, HW), lambda n: (n, 0, 0))),
        compiler_params=pltpu.CompilerParams(
            dimension_semantics=("parallel",),
            vmem_limit_bytes=_VMEM_LIMIT),
    )(*x_list, *p['w1'], p['b1'], p['w2'], p['b2'], p['wa'], p['ba'], p['wb'], p['bb'])
    return hc, pooled


def run_head_affine(hc, g, z_tgt, p):
    N, H, HW = hc.shape
    cout = z_tgt.shape[1]
    zo, ldp = pl.pallas_call(
        f_head_affine_kernel,
        out_shape=(jax.ShapeDtypeStruct((N, cout, HW), jnp.float32),
                   jax.ShapeDtypeStruct((N, 1, HW), jnp.float32)),
        grid=(N,),
        in_specs=[pl.BlockSpec((1, H, HW), lambda n: (n, 0, 0)),
                  pl.BlockSpec((1, 1, HW), lambda n: (n, 0, 0)),
                  pl.BlockSpec((1, cout, HW), lambda n: (n, 0, 0)),
                  _full_spec(p['wz']), _full_spec(p['bz'])],
        out_specs=(pl.BlockSpec((1, cout, HW), lambda n: (n, 0, 0)),
                   pl.BlockSpec((1, 1, HW), lambda n: (n, 0, 0))),
        compiler_params=pltpu.CompilerParams(
            dimension_semantics=("parallel",),
            vmem_limit_bytes=_VMEM_LIMIT),
    )(hc, g, z_tgt, p['wz'], p['bz'])
    return zo, jnp.sum(ldp, axis=(1, 2))


# ----------------------------------------------------------------------------
# Plain-JAX glue: CBAM SpatialGate (7x7 conv + eval-mode BN + sigmoid) on the pooled map
# ----------------------------------------------------------------------------
def spatial_gate_jax(pooled, wsp, Hh, Ww):
    # pooled: [N, 2, HW] (row 0 = channel max, row 1 = channel mean)
    N = pooled.shape[0]
    x = pooled.reshape(N, 2, Hh, Ww)
    y = jax.lax.conv_general_dilated(x, wsp, window_strides=(1, 1), padding='SAME',
                                     dimension_numbers=('NCHW', 'OIHW', 'NCHW'))
    y = y * jax.lax.rsqrt(jnp.float32(1.0 + 1e-5))   # BatchNorm2d(1) in eval with default stats
    return jax.nn.sigmoid(y).reshape(N, 1, Hh * Ww)


# ----------------------------------------------------------------------------
# Coupling application (Pallas path and pure-JAX reference)
# ----------------------------------------------------------------------------
def apply_coupling_pallas(x_list, z_tgt, p, Hh, Ww):
    hc, pooled = run_trunk(x_list, p)
    g = spatial_gate_jax(pooled, p['wsp'], Hh, Ww)
    return run_head_affine(hc, g, z_tgt, p)


def _ref_trunk(x_list, p):
    h1 = p['b1'][None]
    for x, w in zip(x_list, p['w1']):
        h1 = h1 + jnp.einsum('hc,nck->nhk', w, x)
    h1 = jnp.maximum(h1, 0.0)
    h2 = jnp.maximum(jnp.einsum('hg,ngk->nhk', p['w2'], h1) + p['b2'][None], 0.0)
    avg_p = jnp.mean(h2, axis=2, keepdims=True)
    max_p = jnp.max(h2, axis=2, keepdims=True)
    p2 = jnp.concatenate([avg_p, max_p], axis=2)
    hid = jnp.maximum(jnp.einsum('rh,nhm->nrm', p['wa'], p2) + p['ba'][None], 0.0)
    o2 = jnp.einsum('hr,nrm->nhm', p['wb'], hid) + p['bb'][None]
    att = jax.nn.sigmoid(jnp.sum(o2, axis=2, keepdims=True))
    hc = h2 * att
    pooled = jnp.concatenate([jnp.max(hc, axis=1, keepdims=True),
                              jnp.mean(hc, axis=1, keepdims=True)], axis=1)
    return hc, pooled


def apply_coupling_ref(x_list, z_tgt, p, Hh, Ww):
    hc, pooled = _ref_trunk(x_list, p)
    g = spatial_gate_jax(pooled, p['wsp'], Hh, Ww)
    h = hc * g
    hz = jnp.einsum('oh,nhk->nok', p['wz'], h) + p['bz'][None]
    cout = z_tgt.shape[1]
    shift, scale_raw = hz[:, :cout], hz[:, cout:]
    scale = jax.nn.sigmoid(scale_raw + 2.0) + AFFINE_EPS
    return (z_tgt + shift) * scale, jnp.sum(jnp.log(scale), axis=(1, 2))


def cond_affine_forward(z_nchw, ft_nchw, logdet, params, apply_fn):
    """forward (reverse=False) path of CondAffineSeparatedAndCond, channels-major internally."""
    N, C, Hh, Ww = z_nchw.shape
    HW = Hh * Ww
    z = z_nchw.reshape(N, C, HW)
    ft = ft_nchw.reshape(N, -1, HW)
    c_nn = C // 3
    c_co = C - c_nn

    # fFeatures(ft): affine on the full z
    z, ld = apply_fn([ft], z, params['fFeatures'], Hh, Ww)
    logdet = logdet + ld

    # split 'up': z1 conditions, z2 is transformed (fAffine_1)
    z1, z2 = z[:, :c_nn], z[:, c_nn:]
    z2, ld = apply_fn([z1, ft], z2, params['fAffine_1'], Hh, Ww)
    logdet = logdet + ld
    z = jnp.concatenate([z1, z2], axis=1)

    # split 'down': z2 conditions, z1 is transformed (fAffine_2)
    z1, z2 = z[:, :c_co], z[:, c_co:]
    z1, ld = apply_fn([z2, ft], z1, params['fAffine_2'], Hh, Ww)
    logdet = logdet + ld
    z = jnp.concatenate([z1, z2], axis=1)

    return z.reshape(N, C, Hh, Ww), logdet


# ----------------------------------------------------------------------------
# Deterministic parameter init (shapes follow the module's __init__ / F()),
# stored channels-major with ActNorm folded and the zero-conv heads fused.
# ----------------------------------------------------------------------------
def init_f_params(key, c_in_splits, c_out, hidden, reduction=16):
    ks = jax.random.split(key, 12)
    std = 0.05
    r = max(hidden // reduction, 1)
    c_in = sum(c_in_splits)

    w1 = jax.random.normal(ks[0], (c_in, hidden), jnp.float32) * std
    ab1 = jax.random.normal(ks[1], (1, hidden), jnp.float32) * 0.1
    as1 = jnp.exp(jax.random.normal(ks[2], (1, hidden), jnp.float32) * 0.1)
    w2 = jax.random.normal(ks[3], (hidden, hidden), jnp.float32) * std
    ab2 = jax.random.normal(ks[4], (1, hidden), jnp.float32) * 0.1
    as2 = jnp.exp(jax.random.normal(ks[5], (1, hidden), jnp.float32) * 0.1)

    # Fold ActNorm into the 1x1 conv (exact: as* = exp(.) > 0 keeps ReLU ordering) and
    # transpose to channels-major [H, Cin].
    w1f = (w1 * as1).T
    b1f = (ab1 * as1).T                       # [H, 1]
    w2f = (w2 * as2).T
    b2f = (ab2 * as2).T

    # Split w1 per input slab so couplings never materialize cat([z_cond, ft]).
    w1_splits, off = [], 0
    for c in c_in_splits:
        w1_splits.append(w1f[:, off:off + c])
        off += c

    # CBAM ChannelGate shared MLP, channels-major.
    wa = jax.random.normal(ks[6], (hidden, r), jnp.float32) / jnp.sqrt(float(hidden))
    wb = jax.random.normal(ks[7], (r, hidden), jnp.float32) / jnp.sqrt(float(r))
    # CBAM SpatialGate 7x7 conv weight (OIHW).
    wsp = jax.random.normal(ks[8], (1, 2, 7, 7), jnp.float32) * 0.1

    # Conv2dZeros head: out = (h @ wz + bz) * exp(logs*3); fold exp and the 'cross' split
    # (shift = cols 0::2, scale_raw = cols 1::2) into a single fused [2*Cout, H] weight.
    cout = c_out // 2
    wz = jax.random.normal(ks[9], (hidden, c_out), jnp.float32) * 0.05
    bz = jax.random.normal(ks[10], (c_out,), jnp.float32) * 0.05
    logs = jax.random.normal(ks[11], (c_out,), jnp.float32) * 0.05
    e = jnp.exp(logs * 3.0)
    wze = (wz * e[None, :]).T                 # [c_out, H]
    bze = (bz * e)[:, None]                   # [c_out, 1]
    wz_f = jnp.concatenate([wze[0::2], wze[1::2]], axis=0)   # [2*cout, H]
    bz_f = jnp.concatenate([bze[0::2], bze[1::2]], axis=0)   # [2*cout, 1]

    return {
        'w1': tuple(w1_splits), 'b1': b1f, 'w2': w2f, 'b2': b2f,
        'wa': wa.T, 'ba': jnp.zeros((r, 1), jnp.float32),
        'wb': wb.T, 'bb': jnp.zeros((hidden, 1), jnp.float32),
        'wsp': wsp, 'wz': wz_f, 'bz': bz_f,
    }


# ----------------------------------------------------------------------------
if __name__ == "__main__":
    key = jax.random.PRNGKey(0)
    N, C, Hh, Ww = 2, 4, 16, 16          # in_channels = 4
    C_rrdb = 32                          # conditionInFeaDim (repo default is 192)
    hidden = 32                          # hidden_channels (repo default 64)
    c_nn = C // 3                        # 1
    c_co = C - c_nn                      # 3

    k1, k2, k3, kz, kf = jax.random.split(key, 5)
    params = {
        'fFeatures': init_f_params(k1, (C_rrdb,), 2 * C, hidden),
        'fAffine_1': init_f_params(k2, (c_nn, C_rrdb), 2 * c_co, hidden),
        'fAffine_2': init_f_params(k3, (c_nn, C_rrdb), 2 * c_co, hidden),
    }

    z = jax.random.normal(kz, (N, C, Hh, Ww), jnp.float32)
    ft = jax.random.normal(kf, (N, C_rrdb, Hh, Ww), jnp.float32)
    logdet0 = jnp.zeros((N,), jnp.float32)

    fwd = jax.jit(lambda z_, ft_, ld_: cond_affine_forward(
        z_, ft_, ld_, params, apply_coupling_pallas))
    out, logdet = fwd(z, ft, logdet0)
    out, logdet = jax.block_until_ready((out, logdet))

    # Pure-JAX reference for sanity checking (same math, no Pallas).
    out_ref, logdet_ref = cond_affine_forward(z, ft, logdet0, params, apply_coupling_ref)

    assert out.shape == (N, C, Hh, Ww) and logdet.shape == (N,)
    assert bool(jnp.all(jnp.isfinite(out))) and bool(jnp.all(jnp.isfinite(logdet)))
    assert bool(jnp.allclose(out, out_ref, rtol=5e-2, atol=5e-2)), "output mismatch vs reference"
    assert bool(jnp.allclose(logdet, logdet_ref, rtol=5e-2, atol=5e-1)), "logdet mismatch vs reference"

    print("KERNEL_OK")
</pallas_src>

<mosaic_0001>
module attributes {stable_mosaic.version = 11 : i64} {
  func.func @kernel(%arg0: i32, %arg1: memref<1x32x256xf32, #tpu.memory_space<vmem>>, %arg2: memref<32x32xf32, #tpu.memory_space<vmem>>, %arg3: memref<32x1xf32, #tpu.memory_space<vmem>>, %arg4: memref<32x32xf32, #tpu.memory_space<vmem>>, %arg5: memref<32x1xf32, #tpu.memory_space<vmem>>, %arg6: memref<2x32xf32, #tpu.memory_space<vmem>>, %arg7: memref<2x1xf32, #tpu.memory_space<vmem>>, %arg8: memref<32x2xf32, #tpu.memory_space<vmem>>, %arg9: memref<32x1xf32, #tpu.memory_space<vmem>>, %arg10: memref<1x32x256xf32, #tpu.memory_space<vmem>>, %arg11: memref<1x2x256xf32, #tpu.memory_space<vmem>>) attributes {dimension_semantics = [#tpu.dimension_semantics<parallel>], iteration_bounds = array<i64: 2>, scalar_prefetch = 0 : i64, scratch_operands = 0 : i64, tpu.core_type = #tpu.core_type<tc>, window_params = [{transform_indices = @transform_0, window_bounds = array<i64: 1, 32, 256>}, {pipeline_mode = #tpu.pipeline_mode<synchronous>, transform_indices = @transform_1, window_bounds = array<i64: 32, 32>}, {pipeline_mode = #tpu.pipeline_mode<synchronous>, transform_indices = @transform_2, window_bounds = array<i64: 32, 1>}, {pipeline_mode = #tpu.pipeline_mode<synchronous>, transform_indices = @transform_3, window_bounds = array<i64: 32, 32>}, {pipeline_mode = #tpu.pipeline_mode<synchronous>, transform_indices = @transform_4, window_bounds = array<i64: 32, 1>}, {pipeline_mode = #tpu.pipeline_mode<synchronous>, transform_indices = @transform_5, window_bounds = array<i64: 2, 32>}, {pipeline_mode = #tpu.pipeline_mode<synchronous>, transform_indices = @transform_6, window_bounds = array<i64: 2, 1>}, {pipeline_mode = #tpu.pipeline_mode<synchronous>, transform_indices = @transform_7, window_bounds = array<i64: 32, 2>}, {pipeline_mode = #tpu.pipeline_mode<synchronous>, transform_indices = @transform_8, window_bounds = array<i64: 32, 1>}, {transform_indices = @transform_9, window_bounds = array<i64: 1, 32, 256>}, {transform_indices = @transform_10, window_bounds = array<i64: 1, 2, 256>}]} {
    %c0 = arith.constant 0 : index
    %c0_0 = arith.constant 0 : index
    %0 = vector.load %arg3[%c0, %c0_0] : memref<32x1xf32, #tpu.memory_space<vmem>>, vector<32x1xf32>
    %c0_1 = arith.constant 0 : index
    %c0_2 = arith.constant 0 : index
    %1 = vector.load %arg2[%c0_1, %c0_2] : memref<32x32xf32, #tpu.memory_space<vmem>>, vector<32x32xf32>
    %c0_3 = arith.constant 0 : index
    %c0_4 = arith.constant 0 : index
    %c0_5 = arith.constant 0 : index
    %2 = vector.load %arg1[%c0_3, %c0_4, %c0_5] : memref<1x32x256xf32, #tpu.memory_space<vmem>>, vector<1x32x256xf32>
    %3 = vector.shape_cast %2 : vector<1x32x256xf32> to vector<32x256xf32>
    %cst = arith.constant dense<0.000000e+00> : vector<32x256xf32>
    %4 = tpu.matmul %1, %3, %cst {dimension_numbers = #tpu.dot_dimension_numbers<[1], [0], [0], [1], [0, 0, 1, 1], [], []>} : vector<32x32xf32>, vector<32x256xf32>, vector<32x256xf32> -> vector<32x256xf32>
    %5 = vector.broadcast %0 : vector<32x1xf32> to vector<32x256xf32>
    %6 = arith.addf %5, %4 : vector<32x256xf32>
    %cst_6 = arith.constant 0.000000e+00 : f32
    %7 = vector.broadcast %cst_6 : f32 to vector<32x256xf32>
    %8 = arith.maximumf %6, %7 : vector<32x256xf32>
    %c0_7 = arith.constant 0 : index
    %c0_8 = arith.constant 0 : index
    %9 = vector.load %arg4[%c0_7, %c0_8] : memref<32x32xf32, #tpu.memory_space<vmem>>, vector<32x32xf32>
    %cst_9 = arith.constant dense<0.000000e+00> : vector<32x256xf32>
    %10 = tpu.matmul %9, %8, %cst_9 {dimension_numbers = #tpu.dot_dimension_numbers<[1], [0], [0], [1], [0, 0, 1, 1], [], []>} : vector<32x32xf32>, vector<32x256xf32>, vector<32x256xf32> -> vector<32x256xf32>
    %c0_10 = arith.constant 0 : index
    %c0_11 = arith.constant 0 : index
    %11 = vector.load %arg5[%c0_10, %c0_11] : memref<32x1xf32, #tpu.memory_space<vmem>>, vector<32x1xf32>
    %12 = vector.broadcast %11 : vector<32x1xf32> to vector<32x256xf32>
    %13 = arith.addf %10, %12 : vector<32x256xf32>
    %cst_12 = arith.constant 0.000000e+00 : f32
    %14 = vector.broadcast %cst_12 : f32 to vector<32x256xf32>
    %15 = arith.maximumf %13, %14 : vector<32x256xf32>
    %cst_13 = arith.constant dense<0.000000e+00> : vector<32xf32>
    %16 = vector.multi_reduction <add>, %15, %cst_13 [1] : vector<32x256xf32> to vector<32xf32>
    %17 = vector.shape_cast %16 : vector<32xf32> to vector<32x1xf32>
    %cst_14 = arith.constant 2.560000e+02 : f32
    %18 = vector.broadcast %cst_14 : f32 to vector<32x1xf32>
    %19 = arith.divf %17, %18 : vector<32x1xf32>
    %cst_15 = arith.constant dense<0xFF800000> : vector<32xf32>
    %20 = vector.multi_reduction <maximumf>, %15, %cst_15 [1] : vector<32x256xf32> to vector<32xf32>
    %21 = vector.shape_cast %20 : vector<32xf32> to vector<32x1xf32>
    %22 = tpu.concatenate %19, %21 in 1 : vector<32x1xf32>, vector<32x1xf32> -> vector<32x2xf32>
    %c0_16 = arith.constant 0 : index
    %c0_17 = arith.constant 0 : index
    %23 = vector.load %arg6[%c0_16, %c0_17] : memref<2x32xf32, #tpu.memory_space<vmem>>, vector<2x32xf32>
    %cst_18 = arith.constant dense<0.000000e+00> : vector<2x2xf32>
    %24 = tpu.matmul %23, %22, %cst_18 {dimension_numbers = #tpu.dot_dimension_numbers<[1], [0], [0], [1], [0, 0, 1, 1], [], []>} : vector<2x32xf32>, vector<32x2xf32>, vector<2x2xf32> -> vector<2x2xf32>
    %c0_19 = arith.constant 0 : index
    %c0_20 = arith.constant 0 : index
    %25 = vector.load %arg7[%c0_19, %c0_20] : memref<2x1xf32, #tpu.memory_space<vmem>>, vector<2x1xf32>
    %26 = vector.broadcast %25 : vector<2x1xf32> to vector<2x2xf32>
    %27 = arith.addf %24, %26 : vector<2x2xf32>
    %cst_21 = arith.constant 0.000000e+00 : f32
    %28 = vector.broadcast %cst_21 : f32 to vector<2x2xf32>
    %29 = arith.maximumf %27, %28 : vector<2x2xf32>
    %c0_22 = arith.constant 0 : index
    %c0_23 = arith.constant 0 : index
    %30 = vector.load %arg8[%c0_22, %c0_23] : memref<32x2xf32, #tpu.memory_space<vmem>>, vector<32x2xf32>
    %cst_24 = arith.constant dense<0.000000e+00> : vector<32x2xf32>
    %31 = tpu.matmul %30, %29, %cst_24 {dimension_numbers = #tpu.dot_dimension_numbers<[1], [0], [0], [1], [0, 0, 1, 1], [], []>} : vector<32x2xf32>, vector<2x2xf32>, vector<32x2xf32> -> vector<32x2xf32>
    %c0_25 = arith.constant 0 : index
    %c0_26 = arith.constant 0 : index
    %32 = vector.load %arg9[%c0_25, %c0_26] : memref<32x1xf32, #tpu.memory_space<vmem>>, vector<32x1xf32>
    %33 = vector.broadcast %32 : vector<32x1xf32> to vector<32x2xf32>
    %34 = arith.addf %31, %33 : vector<32x2xf32>
    %cst_27 = arith.constant dense<0.000000e+00> : vector<32xf32>
    %35 = vector.multi_reduction <add>, %34, %cst_27 [1] : vector<32x2xf32> to vector<32xf32>
    %36 = vector.shape_cast %35 : vector<32xf32> to vector<32x1xf32>
    %37 = arith.negf %36 : vector<32x1xf32>
    %38 = math.exp %37 : vector<32x1xf32>
    %cst_28 = arith.constant 1.000000e+00 : f32
    %39 = vector.broadcast %cst_28 : f32 to vector<32x1xf32>
    %40 = arith.addf %39, %38 : vector<32x1xf32>
    %41 = arith.divf %39, %40 : vector<32x1xf32>
    %42 = vector.broadcast %41 : vector<32x1xf32> to vector<32x256xf32>
    %43 = arith.mulf %15, %42 : vector<32x256xf32>
    %c0_29 = arith.constant 0 : index
    %c0_30 = arith.constant 0 : index
    %c0_31 = arith.constant 0 : index
    %44 = vector.load %arg10[%c0_29, %c0_30, %c0_31] : memref<1x32x256xf32, #tpu.memory_space<vmem>>, vector<1x32x256xf32>
    %45 = vector.shape_cast %44 : vector<1x32x256xf32> to vector<32x256xf32>
    %46 = vector.shape_cast %43 : vector<32x256xf32> to vector<1x32x256xf32>
    tpu.vector_store %arg10[%c0_29, %c0_30, %c0_31], %46 {strides = array<i32>} : memref<1x32x256xf32, #tpu.memory_space<vmem>>, vector<1x32x256xf32>,
    %cst_32 = arith.constant dense<0xFF800000> : vector<256xf32>
    %47 = vector.multi_reduction <maximumf>, %43, %cst_32 [0] : vector<32x256xf32> to vector<256xf32>
    %48 = vector.shape_cast %47 : vector<256xf32> to vector<1x256xf32>
    %cst_33 = arith.constant dense<0.000000e+00> : vector<256xf32>
    %49 = vector.multi_reduction <add>, %43, %cst_33 [0] : vector<32x256xf32> to vector<256xf32>
    %50 = vector.shape_cast %49 : vector<256xf32> to vector<1x256xf32>
    %cst_34 = arith.constant 3.200000e+01 : f32
    %51 = vector.broadcast %cst_34 : f32 to vector<1x256xf32>
    %52 = arith.divf %50, %51 : vector<1x256xf32>
    %53 = tpu.concatenate %48, %52 in 0 : vector<1x256xf32>, vector<1x256xf32> -> vector<2x256xf32>
    %c0_35 = arith.constant 0 : index
    %c0_36 = arith.constant 0 : index
    %c0_37 = arith.constant 0 : index
    %54 = vector.load %arg11[%c0_35, %c0_36, %c0_37] : memref<1x2x256xf32, #tpu.memory_space<vmem>>, vector<1x2x256xf32>
    %55 = vector.shape_cast %54 : vector<1x2x256xf32> to vector<2x256xf32>
    %56 = vector.shape_cast %53 : vector<2x256xf32> to vector<1x2x256xf32>
    tpu.vector_store %arg11[%c0_35, %c0_36, %c0_37], %56 {strides = array<i32>} : memref<1x2x256xf32, #tpu.memory_space<vmem>>, vector<1x2x256xf32>,
    return
  }
  func.func @transform_0(%arg0: i32) -> (i32, i32, i32) {
    %c0_i32 = arith.constant 0 : i32
    %c0_i32_0 = arith.constant 0 : i32
    %c0_i32_1 = arith.constant 0 : i32
    return %arg0, %c0_i32, %c0_i32_0 : i32, i32, i32
  }
  func.func @transform_1(%arg0: i32) -> (i32, i32) {
    %c0_i32 = arith.constant 0 : i32
    %c0_i32_0 = arith.constant 0 : i32
    %c0_i32_1 = arith.constant 0 : i32
    return %c0_i32, %c0_i32_0 : i32, i32
  }
  func.func @transform_2(%arg0: i32) -> (i32, i32) {
    %c0_i32 = arith.constant 0 : i32
    %c0_i32_0 = arith.constant 0 : i32
    %c0_i32_1 = arith.constant 0 : i32
    return %c0_i32, %c0_i32_0 : i32, i32
  }
  func.func @transform_3(%arg0: i32) -> (i32, i32) {
    %c0_i32 = arith.constant 0 : i32
    %c0_i32_0 = arith.constant 0 : i32
    %c0_i32_1 = arith.constant 0 : i32
    return %c0_i32, %c0_i32_0 : i32, i32
  }
  func.func @transform_4(%arg0: i32) -> (i32, i32) {
    %c0_i32 = arith.constant 0 : i32
    %c0_i32_0 = arith.constant 0 : i32
    %c0_i32_1 = arith.constant 0 : i32
    return %c0_i32, %c0_i32_0 : i32, i32
  }
  func.func @transform_5(%arg0: i32) -> (i32, i32) {
    %c0_i32 = arith.constant 0 : i32
    %c0_i32_0 = arith.constant 0 : i32
    %c0_i32_1 = arith.constant 0 : i32
    return %c0_i32, %c0_i32_0 : i32, i32
  }
  func.func @transform_6(%arg0: i32) -> (i32, i32) {
    %c0_i32 = arith.constant 0 : i32
    %c0_i32_0 = arith.constant 0 : i32
    %c0_i32_1 = arith.constant 0 : i32
    return %c0_i32, %c0_i32_0 : i32, i32
  }
  func.func @transform_7(%arg0: i32) -> (i32, i32) {
    %c0_i32 = arith.constant 0 : i32
    %c0_i32_0 = arith.constant 0 : i32
    %c0_i32_1 = arith.constant 0 : i32
    return %c0_i32, %c0_i32_0 : i32, i32
  }
  func.func @transform_8(%arg0: i32) -> (i32, i32) {
    %c0_i32 = arith.constant 0 : i32
    %c0_i32_0 = arith.constant 0 : i32
    %c0_i32_1 = arith.constant 0 : i32
    return %c0_i32, %c0_i32_0 : i32, i32
  }
  func.func @transform_9(%arg0: i32) -> (i32, i32, i32) {
    %c0_i32 = arith.constant 0 : i32
    %c0_i32_0 = arith.constant 0 : i32
    %c0_i32_1 = arith.constant 0 : i32
    return %arg0, %c0_i32, %c0_i32_0 : i32, i32, i32
  }
  func.func @transform_10(%arg0: i32) -> (i32, i32, i32) {
    %c0_i32 = arith.constant 0 : i32
    %c0_i32_0 = arith.constant 0 : i32
    %c0_i32_1 = arith.constant 0 : i32
    return %arg0, %c0_i32, %c0_i32_0 : i32, i32, i32
  }
}

module attributes {stable_mosaic.version = 11 : i64} {
  func.func @f_head_affine_kernel(%arg0: i32, %arg1: memref<1x32x256xf32, #tpu.memory_space<vmem>>, %arg2: memref<1x1x256xf32, #tpu.memory_space<vmem>>, %arg3: memref<1x4x256xf32, #tpu.memory_space<vmem>>, %arg4: memref<8x32xf32, #tpu.memory_space<vmem>>, %arg5: memref<8x1xf32, #tpu.memory_space<vmem>>, %arg6: memref<1x4x256xf32, #tpu.memory_space<vmem>>, %arg7: memref<1x1x256xf32, #tpu.memory_space<vmem>>) attributes {dimension_semantics = [#tpu.dimension_semantics<parallel>], iteration_bounds = array<i64: 2>, scalar_prefetch = 0 : i64, scratch_operands = 0 : i64, tpu.core_type = #tpu.core_type<tc>, window_params = [{transform_indices = @transform_0, window_bounds = array<i64: 1, 32, 256>}, {transform_indices = @transform_1, window_bounds = array<i64: 1, 1, 256>}, {transform_indices = @transform_2, window_bounds = array<i64: 1, 4, 256>}, {pipeline_mode = #tpu.pipeline_mode<synchronous>, transform_indices = @transform_3, window_bounds = array<i64: 8, 32>}, {pipeline_mode = #tpu.pipeline_mode<synchronous>, transform_indices = @transform_4, window_bounds = array<i64: 8, 1>}, {transform_indices = @transform_5, window_bounds = array<i64: 1, 4, 256>}, {transform_indices = @transform_6, window_bounds = array<i64: 1, 1, 256>}]} {
    %c0 = arith.constant 0 : index
    %c0_0 = arith.constant 0 : index
    %c0_1 = arith.constant 0 : index
    %0 = vector.load %arg1[%c0, %c0_0, %c0_1] : memref<1x32x256xf32, #tpu.memory_space<vmem>>, vector<1x32x256xf32>
    %1 = vector.shape_cast %0 : vector<1x32x256xf32> to vector<32x256xf32>
    %c0_2 = arith.constant 0 : index
    %c0_3 = arith.constant 0 : index
    %c0_4 = arith.constant 0 : index
    %2 = vector.load %arg2[%c0_2, %c0_3, %c0_4] : memref<1x1x256xf32, #tpu.memory_space<vmem>>, vector<1x1x256xf32>
    %3 = vector.shape_cast %2 : vector<1x1x256xf32> to vector<1x256xf32>
    %4 = vector.broadcast %3 : vector<1x256xf32> to vector<32x256xf32>
    %5 = arith.mulf %1, %4 : vector<32x256xf32>
    %c0_5 = arith.constant 0 : index
    %c0_6 = arith.constant 0 : index
    %6 = vector.load %arg4[%c0_5, %c0_6] : memref<8x32xf32, #tpu.memory_space<vmem>>, vector<8x32xf32>
    %cst = arith.constant dense<0.000000e+00> : vector<8x256xf32>
    %7 = tpu.matmul %6, %5, %cst {dimension_numbers = #tpu.dot_dimension_numbers<[1], [0], [0], [1], [0, 0, 1, 1], [], []>} : vector<8x32xf32>, vector<32x256xf32>, vector<8x256xf32> -> vector<8x256xf32>
    %c0_7 = arith.constant 0 : index
    %c0_8 = arith.constant 0 : index
    %8 = vector.load %arg5[%c0_7, %c0_8] : memref<8x1xf32, #tpu.memory_space<vmem>>, vector<8x1xf32>
    %9 = vector.broadcast %8 : vector<8x1xf32> to vector<8x256xf32>
    %10 = arith.addf %7, %9 : vector<8x256xf32>
    %11 = vector.extract_strided_slice %10 {offsets = [0, 0], sizes = [4, 256], strides = [1, 1]} : vector<8x256xf32> to vector<4x256xf32>
    %12 = vector.extract_strided_slice %10 {offsets = [4, 0], sizes = [4, 256], strides = [1, 1]} : vector<8x256xf32> to vector<4x256xf32>
    %cst_9 = arith.constant 2.000000e+00 : f32
    %13 = vector.broadcast %cst_9 : f32 to vector<4x256xf32>
    %14 = arith.addf %12, %13 : vector<4x256xf32>
    %15 = arith.negf %14 : vector<4x256xf32>
    %16 = math.exp %15 : vector<4x256xf32>
    %cst_10 = arith.constant 1.000000e+00 : f32
    %17 = vector.broadcast %cst_10 : f32 to vector<4x256xf32>
    %18 = arith.addf %17, %16 : vector<4x256xf32>
    %19 = arith.divf %17, %18 : vector<4x256xf32>
    %cst_11 = arith.constant 9.99999974E-5 : f32
    %20 = vector.broadcast %cst_11 : f32 to vector<4x256xf32>
    %21 = arith.addf %19, %20 : vector<4x256xf32>
    %c0_12 = arith.constant 0 : index
    %c0_13 = arith.constant 0 : index
    %c0_14 = arith.constant 0 : index
    %22 = vector.load %arg3[%c0_12, %c0_13, %c0_14] : memref<1x4x256xf32, #tpu.memory_space<vmem>>, vector<1x4x256xf32>
    %23 = vector.shape_cast %22 : vector<1x4x256xf32> to vector<4x256xf32>
    %24 = arith.addf %23, %11 : vector<4x256xf32>
    %25 = arith.mulf %24, %21 : vector<4x256xf32>
    %c0_15 = arith.constant 0 : index
    %c0_16 = arith.constant 0 : index
    %c0_17 = arith.constant 0 : index
    %26 = vector.load %arg6[%c0_15, %c0_16, %c0_17] : memref<1x4x256xf32, #tpu.memory_space<vmem>>, vector<1x4x256xf32>
    %27 = vector.shape_cast %26 : vector<1x4x256xf32> to vector<4x256xf32>
    %28 = vector.shape_cast %25 : vector<4x256xf32> to vector<1x4x256xf32>
    tpu.vector_store %arg6[%c0_15, %c0_16, %c0_17], %28 {strides = array<i32>} : memref<1x4x256xf32, #tpu.memory_space<vmem>>, vector<1x4x256xf32>,
    %29 = math.log %21 : vector<4x256xf32>
    %cst_18 = arith.constant dense<0.000000e+00> : vector<256xf32>
    %30 = vector.multi_reduction <add>, %29, %cst_18 [0] : vector<4x256xf32> to vector<256xf32>
    %31 = vector.shape_cast %30 : vector<256xf32> to vector<1x256xf32>
    %c0_19 = arith.constant 0 : index
    %c0_20 = arith.constant 0 : index
    %c0_21 = arith.constant 0 : index
    %32 = vector.load %arg7[%c0_19, %c0_20, %c0_21] : memref<1x1x256xf32, #tpu.memory_space<vmem>>, vector<1x1x256xf32>
    %33 = vector.shape_cast %32 : vector<1x1x256xf32> to vector<1x256xf32>
    %34 = vector.shape_cast %31 : vector<1x256xf32> to vector<1x1x256xf32>
    tpu.vector_store %arg7[%c0_19, %c0_20, %c0_21], %34 {strides = array<i32>} : memref<1x1x256xf32, #tpu.memory_space<vmem>>, vector<1x1x256xf32>,
    return
  }
  func.func @transform_0(%arg0: i32) -> (i32, i32, i32) {
    %c0_i32 = arith.constant 0 : i32
    %c0_i32_0 = arith.constant 0 : i32
    %c0_i32_1 = arith.constant 0 : i32
    return %arg0, %c0_i32, %c0_i32_0 : i32, i32, i32
  }
  func.func @transform_1(%arg0: i32) -> (i32, i32, i32) {
    %c0_i32 = arith.constant 0 : i32
    %c0_i32_0 = arith.constant 0 : i32
    %c0_i32_1 = arith.constant 0 : i32
    return %arg0, %c0_i32, %c0_i32_0 : i32, i32, i32
  }
  func.func @transform_2(%arg0: i32) -> (i32, i32, i32) {
    %c0_i32 = arith.constant 0 : i32
    %c0_i32_0 = arith.constant 0 : i32
    %c0_i32_1 = arith.constant 0 : i32
    return %arg0, %c0_i32, %c0_i32_0 : i32, i32, i32
  }
  func.func @transform_3(%arg0: i32) -> (i32, i32) {
    %c0_i32 = arith.constant 0 : i32
    %c0_i32_0 = arith.constant 0 : i32
    %c0_i32_1 = arith.constant 0 : i32
    return %c0_i32, %c0_i32_0 : i32, i32
  }
  func.func @transform_4(%arg0: i32) -> (i32, i32) {
    %c0_i32 = arith.constant 0 : i32
    %c0_i32_0 = arith.constant 0 : i32
    %c0_i32_1 = arith.constant 0 : i32
    return %c0_i32, %c0_i32_0 : i32, i32
  }
  func.func @transform_5(%arg0: i32) -> (i32, i32, i32) {
    %c0_i32 = arith.constant 0 : i32
    %c0_i32_0 = arith.constant 0 : i32
    %c0_i32_1 = arith.constant 0 : i32
    return %arg0, %c0_i32, %c0_i32_0 : i32, i32, i32
  }
  func.func @transform_6(%arg0: i32) -> (i32, i32, i32) {
    %c0_i32 = arith.constant 0 : i32
    %c0_i32_0 = arith.constant 0 : i32
    %c0_i32_1 = arith.constant 0 : i32
    return %arg0, %c0_i32, %c0_i32_0 : i32, i32, i32
  }
}

module attributes {stable_mosaic.version = 11 : i64} {
  func.func @kernel(%arg0: i32, %arg1: memref<1x1x256xf32, #tpu.memory_space<vmem>>, %arg2: memref<1x32x256xf32, #tpu.memory_space<vmem>>, %arg3: memref<32x1xf32, #tpu.memory_space<vmem>>, %arg4: memref<32x32xf32, #tpu.memory_space<vmem>>, %arg5: memref<32x1xf32, #tpu.memory_space<vmem>>, %arg6: memref<32x32xf32, #tpu.memory_space<vmem>>, %arg7: memref<32x1xf32, #tpu.memory_space<vmem>>, %arg8: memref<2x32xf32, #tpu.memory_space<vmem>>, %arg9: memref<2x1xf32, #tpu.memory_space<vmem>>, %arg10: memref<32x2xf32, #tpu.memory_space<vmem>>, %arg11: memref<32x1xf32, #tpu.memory_space<vmem>>, %arg12: memref<1x32x256xf32, #tpu.memory_space<vmem>>, %arg13: memref<1x2x256xf32, #tpu.memory_space<vmem>>) attributes {dimension_semantics = [#tpu.dimension_semantics<parallel>], iteration_bounds = array<i64: 2>, scalar_prefetch = 0 : i64, scratch_operands = 0 : i64, tpu.core_type = #tpu.core_type<tc>, window_params = [{transform_indices = @transform_0, window_bounds = array<i64: 1, 1, 256>}, {transform_indices = @transform_1, window_bounds = array<i64: 1, 32, 256>}, {pipeline_mode = #tpu.pipeline_mode<synchronous>, transform_indices = @transform_2, window_bounds = array<i64: 32, 1>}, {pipeline_mode = #tpu.pipeline_mode<synchronous>, transform_indices = @transform_3, window_bounds = array<i64: 32, 32>}, {pipeline_mode = #tpu.pipeline_mode<synchronous>, transform_indices = @transform_4, window_bounds = array<i64: 32, 1>}, {pipeline_mode = #tpu.pipeline_mode<synchronous>, transform_indices = @transform_5, window_bounds = array<i64: 32, 32>}, {pipeline_mode = #tpu.pipeline_mode<synchronous>, transform_indices = @transform_6, window_bounds = array<i64: 32, 1>}, {pipeline_mode = #tpu.pipeline_mode<synchronous>, transform_indices = @transform_7, window_bounds = array<i64: 2, 32>}, {pipeline_mode = #tpu.pipeline_mode<synchronous>, transform_indices = @transform_8, window_bounds = array<i64: 2, 1>}, {pipeline_mode = #tpu.pipeline_mode<synchronous>, transform_indices = @transform_9, window_bounds = array<i64: 32, 2>}, {pipeline_mode = #tpu.pipeline_mode<synchronous>, transform_indices = @transform_10, window_bounds = array<i64: 32, 1>}, {transform_indices = @transform_11, window_bounds = array<i64: 1, 32, 256>}, {transform_indices = @transform_12, window_bounds = array<i64: 1, 2, 256>}]} {
    %c0 = arith.constant 0 : index
    %c0_0 = arith.constant 0 : index
    %0 = vector.load %arg5[%c0, %c0_0] : memref<32x1xf32, #tpu.memory_space<vmem>>, vector<32x1xf32>
    %c0_1 = arith.constant 0 : index
    %c0_2 = arith.constant 0 : index
    %1 = vector.load %arg3[%c0_1, %c0_2] : memref<32x1xf32, #tpu.memory_space<vmem>>, vector<32x1xf32>
    %c0_3 = arith.constant 0 : index
    %c0_4 = arith.constant 0 : index
    %c0_5 = arith.constant 0 : index
    %2 = vector.load %arg1[%c0_3, %c0_4, %c0_5] : memref<1x1x256xf32, #tpu.memory_space<vmem>>, vector<1x1x256xf32>
    %3 = vector.shape_cast %2 : vector<1x1x256xf32> to vector<1x256xf32>
    %cst = arith.constant dense<0.000000e+00> : vector<32x256xf32>
    %4 = tpu.matmul %1, %3, %cst {dimension_numbers = #tpu.dot_dimension_numbers<[1], [0], [0], [1], [0, 0, 1, 1], [], []>} : vector<32x1xf32>, vector<1x256xf32>, vector<32x256xf32> -> vector<32x256xf32>
    %5 = vector.broadcast %0 : vector<32x1xf32> to vector<32x256xf32>
    %6 = arith.addf %5, %4 : vector<32x256xf32>
    %c0_6 = arith.constant 0 : index
    %c0_7 = arith.constant 0 : index
    %7 = vector.load %arg4[%c0_6, %c0_7] : memref<32x32xf32, #tpu.memory_space<vmem>>, vector<32x32xf32>
    %c0_8 = arith.constant 0 : index
    %c0_9 = arith.constant 0 : index
    %c0_10 = arith.constant 0 : index
    %8 = vector.load %arg2[%c0_8, %c0_9, %c0_10] : memref<1x32x256xf32, #tpu.memory_space<vmem>>, vector<1x32x256xf32>
    %9 = vector.shape_cast %8 : vector<1x32x256xf32> to vector<32x256xf32>
    %cst_11 = arith.constant dense<0.000000e+00> : vector<32x256xf32>
    %10 = tpu.matmul %7, %9, %cst_11 {dimension_numbers = #tpu.dot_dimension_numbers<[1], [0], [0], [1], [0, 0, 1, 1], [], []>} : vector<32x32xf32>, vector<32x256xf32>, vector<32x256xf32> -> vector<32x256xf32>
    %11 = arith.addf %6, %10 : vector<32x256xf32>
    %cst_12 = arith.constant 0.000000e+00 : f32
    %12 = vector.broadcast %cst_12 : f32 to vector<32x256xf32>
    %13 = arith.maximumf %11, %12 : vector<32x256xf32>
    %c0_13 = arith.constant 0 : index
    %c0_14 = arith.constant 0 : index
    %14 = vector.load %arg6[%c0_13, %c0_14] : memref<32x32xf32, #tpu.memory_space<vmem>>, vector<32x32xf32>
    %cst_15 = arith.constant dense<0.000000e+00> : vector<32x256xf32>
    %15 = tpu.matmul %14, %13, %cst_15 {dimension_numbers = #tpu.dot_dimension_numbers<[1], [0], [0], [1], [0, 0, 1, 1], [], []>} : vector<32x32xf32>, vector<32x256xf32>, vector<32x256xf32> -> vector<32x256xf32>
    %c0_16 = arith.constant 0 : index
    %c0_17 = arith.constant 0 : index
    %16 = vector.load %arg7[%c0_16, %c0_17] : memref<32x1xf32, #tpu.memory_space<vmem>>, vector<32x1xf32>
    %17 = vector.broadcast %16 : vector<32x1xf32> to vector<32x256xf32>
    %18 = arith.addf %15, %17 : vector<32x256xf32>
    %cst_18 = arith.constant 0.000000e+00 : f32
    %19 = vector.broadcast %cst_18 : f32 to vector<32x256xf32>
    %20 = arith.maximumf %18, %19 : vector<32x256xf32>
    %cst_19 = arith.constant dense<0.000000e+00> : vector<32xf32>
    %21 = vector.multi_reduction <add>, %20, %cst_19 [1] : vector<32x256xf32> to vector<32xf32>
    %22 = vector.shape_cast %21 : vector<32xf32> to vector<32x1xf32>
    %cst_20 = arith.constant 2.560000e+02 : f32
    %23 = vector.broadcast %cst_20 : f32 to vector<32x1xf32>
    %24 = arith.divf %22, %23 : vector<32x1xf32>
    %cst_21 = arith.constant dense<0xFF800000> : vector<32xf32>
    %25 = vector.multi_reduction <maximumf>, %20, %cst_21 [1] : vector<32x256xf32> to vector<32xf32>
    %26 = vector.shape_cast %25 : vector<32xf32> to vector<32x1xf32>
    %27 = tpu.concatenate %24, %26 in 1 : vector<32x1xf32>, vector<32x1xf32> -> vector<32x2xf32>
    %c0_22 = arith.constant 0 : index
    %c0_23 = arith.constant 0 : index
    %28 = vector.load %arg8[%c0_22, %c0_23] : memref<2x32xf32, #tpu.memory_space<vmem>>, vector<2x32xf32>
    %cst_24 = arith.constant dense<0.000000e+00> : vector<2x2xf32>
    %29 = tpu.matmul %28, %27, %cst_24 {dimension_numbers = #tpu.dot_dimension_numbers<[1], [0], [0], [1], [0, 0, 1, 1], [], []>} : vector<2x32xf32>, vector<32x2xf32>, vector<2x2xf32> -> vector<2x2xf32>
    %c0_25 = arith.constant 0 : index
    %c0_26 = arith.constant 0 : index
    %30 = vector.load %arg9[%c0_25, %c0_26] : memref<2x1xf32, #tpu.memory_space<vmem>>, vector<2x1xf32>
    %31 = vector.broadcast %30 : vector<2x1xf32> to vector<2x2xf32>
    %32 = arith.addf %29, %31 : vector<2x2xf32>
    %cst_27 = arith.constant 0.000000e+00 : f32
    %33 = vector.broadcast %cst_27 : f32 to vector<2x2xf32>
    %34 = arith.maximumf %32, %33 : vector<2x2xf32>
    %c0_28 = arith.constant 0 : index
    %c0_29 = arith.constant 0 : index
    %35 = vector.load %arg10[%c0_28, %c0_29] : memref<32x2xf32, #tpu.memory_space<vmem>>, vector<32x2xf32>
    %cst_30 = arith.constant dense<0.000000e+00> : vector<32x2xf32>
    %36 = tpu.matmul %35, %34, %cst_30 {dimension_numbers = #tpu.dot_dimension_numbers<[1], [0], [0], [1], [0, 0, 1, 1], [], []>} : vector<32x2xf32>, vector<2x2xf32>, vector<32x2xf32> -> vector<32x2xf32>
    %c0_31 = arith.constant 0 : index
    %c0_32 = arith.constant 0 : index
    %37 = vector.load %arg11[%c0_31, %c0_32] : memref<32x1xf32, #tpu.memory_space<vmem>>, vector<32x1xf32>
    %38 = vector.broadcast %37 : vector<32x1xf32> to vector<32x2xf32>
    %39 = arith.addf %36, %38 : vector<32x2xf32>
    %cst_33 = arith.constant dense<0.000000e+00> : vector<32xf32>
    %40 = vector.multi_reduction <add>, %39, %cst_33 [1] : vector<32x2xf32> to vector<32xf32>
    %41 = vector.shape_cast %40 : vector<32xf32> to vector<32x1xf32>
    %42 = arith.negf %41 : vector<32x1xf32>
    %43 = math.exp %42 : vector<32x1xf32>
    %cst_34 = arith.constant 1.000000e+00 : f32
    %44 = vector.broadcast %cst_34 : f32 to vector<32x1xf32>
    %45 = arith.addf %44, %43 : vector<32x1xf32>
    %46 = arith.divf %44, %45 : vector<32x1xf32>
    %47 = vector.broadcast %46 : vector<32x1xf32> to vector<32x256xf32>
    %48 = arith.mulf %20, %47 : vector<32x256xf32>
    %c0_35 = arith.constant 0 : index
    %c0_36 = arith.constant 0 : index
    %c0_37 = arith.constant 0 : index
    %49 = vector.load %arg12[%c0_35, %c0_36, %c0_37] : memref<1x32x256xf32, #tpu.memory_space<vmem>>, vector<1x32x256xf32>
    %50 = vector.shape_cast %49 : vector<1x32x256xf32> to vector<32x256xf32>
    %51 = vector.shape_cast %48 : vector<32x256xf32> to vector<1x32x256xf32>
    tpu.vector_store %arg12[%c0_35, %c0_36, %c0_37], %51 {strides = array<i32>} : memref<1x32x256xf32, #tpu.memory_space<vmem>>, vector<1x32x256xf32>,
    %cst_38 = arith.constant dense<0xFF800000> : vector<256xf32>
    %52 = vector.multi_reduction <maximumf>, %48, %cst_38 [0] : vector<32x256xf32> to vector<256xf32>
    %53 = vector.shape_cast %52 : vector<256xf32> to vector<1x256xf32>
    %cst_39 = arith.constant dense<0.000000e+00> : vector<256xf32>
    %54 = vector.multi_reduction <add>, %48, %cst_39 [0] : vector<32x256xf32> to vector<256xf32>
    %55 = vector.shape_cast %54 : vector<256xf32> to vector<1x256xf32>
    %cst_40 = arith.constant 3.200000e+01 : f32
    %56 = vector.broadcast %cst_40 : f32 to vector<1x256xf32>
    %57 = arith.divf %55, %56 : vector<1x256xf32>
    %58 = tpu.concatenate %53, %57 in 0 : vector<1x256xf32>, vector<1x256xf32> -> vector<2x256xf32>
    %c0_41 = arith.constant 0 : index
    %c0_42 = arith.constant 0 : index
    %c0_43 = arith.constant 0 : index
    %59 = vector.load %arg13[%c0_41, %c0_42, %c0_43] : memref<1x2x256xf32, #tpu.memory_space<vmem>>, vector<1x2x256xf32>
    %60 = vector.shape_cast %59 : vector<1x2x256xf32> to vector<2x256xf32>
    %61 = vector.shape_cast %58 : vector<2x256xf32> to vector<1x2x256xf32>
    tpu.vector_store %arg13[%c0_41, %c0_42, %c0_43], %61 {strides = array<i32>} : memref<1x2x256xf32, #tpu.memory_space<vmem>>, vector<1x2x256xf32>,
    return
  }
  func.func @transform_0(%arg0: i32) -> (i32, i32, i32) {
    %c0_i32 = arith.constant 0 : i32
    %c0_i32_0 = arith.constant 0 : i32
    %c0_i32_1 = arith.constant 0 : i32
    return %arg0, %c0_i32, %c0_i32_0 : i32, i32, i32
  }
  func.func @transform_1(%arg0: i32) -> (i32, i32, i32) {
    %c0_i32 = arith.constant 0 : i32
    %c0_i32_0 = arith.constant 0 : i32
    %c0_i32_1 = arith.constant 0 : i32
    return %arg0, %c0_i32, %c0_i32_0 : i32, i32, i32
  }
  func.func @transform_2(%arg0: i32) -> (i32, i32) {
    %c0_i32 = arith.constant 0 : i32
    %c0_i32_0 = arith.constant 0 : i32
    %c0_i32_1 = arith.constant 0 : i32
    return %c0_i32, %c0_i32_0 : i32, i32
  }
  func.func @transform_3(%arg0: i32) -> (i32, i32) {
    %c0_i32 = arith.constant 0 : i32
    %c0_i32_0 = arith.constant 0 : i32
    %c0_i32_1 = arith.constant 0 : i32
    return %c0_i32, %c0_i32_0 : i32, i32
  }
  func.func @transform_4(%arg0: i32) -> (i32, i32) {
    %c0_i32 = arith.constant 0 : i32
    %c0_i32_0 = arith.constant 0 : i32
    %c0_i32_1 = arith.constant 0 : i32
    return %c0_i32, %c0_i32_0 : i32, i32
  }
  func.func @transform_5(%arg0: i32) -> (i32, i32) {
    %c0_i32 = arith.constant 0 : i32
    %c0_i32_0 = arith.constant 0 : i32
    %c0_i32_1 = arith.constant 0 : i32
    return %c0_i32, %c0_i32_0 : i32, i32
  }
  func.func @transform_6(%arg0: i32) -> (i32, i32) {
    %c0_i32 = arith.constant 0 : i32
    %c0_i32_0 = arith.constant 0 : i32
    %c0_i32_1 = arith.constant 0 : i32
    return %c0_i32, %c0_i32_0 : i32, i32
  }
  func.func @transform_7(%arg0: i32) -> (i32, i32) {
    %c0_i32 = arith.constant 0 : i32
    %c0_i32_0 = arith.constant 0 : i32
    %c0_i32_1 = arith.constant 0 : i32
    return %c0_i32, %c0_i32_0 : i32, i32
  }
  func.func @transform_8(%arg0: i32) -> (i32, i32) {
    %c0_i32 = arith.constant 0 : i32
    %c0_i32_0 = arith.constant 0 : i32
    %c0_i32_1 = arith.constant 0 : i32
    return %c0_i32, %c0_i32_0 : i32, i32
  }
  func.func @transform_9(%arg0: i32) -> (i32, i32) {
    %c0_i32 = arith.constant 0 : i32
    %c0_i32_0 = arith.constant 0 : i32
    %c0_i32_1 = arith.constant 0 : i32
    return %c0_i32, %c0_i32_0 : i32, i32
  }
  func.func @transform_10(%arg0: i32) -> (i32, i32) {
    %c0_i32 = arith.constant 0 : i32
    %c0_i32_0 = arith.constant 0 : i32
    %c0_i32_1 = arith.constant 0 : i32
    return %c0_i32, %c0_i32_0 : i32, i32
  }
  func.func @transform_11(%arg0: i32) -> (i32, i32, i32) {
    %c0_i32 = arith.constant 0 : i32
    %c0_i32_0 = arith.constant 0 : i32
    %c0_i32_1 = arith.constant 0 : i32
    return %arg0, %c0_i32, %c0_i32_0 : i32, i32, i32
  }
  func.func @transform_12(%arg0: i32) -> (i32, i32, i32) {
    %c0_i32 = arith.constant 0 : i32
    %c0_i32_0 = arith.constant 0 : i32
    %c0_i32_1 = arith.constant 0 : i32
    return %arg0, %c0_i32, %c0_i32_0 : i32, i32, i32
  }
}

module attributes {stable_mosaic.version = 11 : i64} {
  func.func @f_head_affine_kernel(%arg0: i32, %arg1: memref<1x32x256xf32, #tpu.memory_space<vmem>>, %arg2: memref<1x1x256xf32, #tpu.memory_space<vmem>>, %arg3: memref<1x3x256xf32, #tpu.memory_space<vmem>>, %arg4: memref<6x32xf32, #tpu.memory_space<vmem>>, %arg5: memref<6x1xf32, #tpu.memory_space<vmem>>, %arg6: memref<1x3x256xf32, #tpu.memory_space<vmem>>, %arg7: memref<1x1x256xf32, #tpu.memory_space<vmem>>) attributes {dimension_semantics = [#tpu.dimension_semantics<parallel>], iteration_bounds = array<i64: 2>, scalar_prefetch = 0 : i64, scratch_operands = 0 : i64, tpu.core_type = #tpu.core_type<tc>, window_params = [{transform_indices = @transform_0, window_bounds = array<i64: 1, 32, 256>}, {transform_indices = @transform_1, window_bounds = array<i64: 1, 1, 256>}, {transform_indices = @transform_2, window_bounds = array<i64: 1, 3, 256>}, {pipeline_mode = #tpu.pipeline_mode<synchronous>, transform_indices = @transform_3, window_bounds = array<i64: 6, 32>}, {pipeline_mode = #tpu.pipeline_mode<synchronous>, transform_indices = @transform_4, window_bounds = array<i64: 6, 1>}, {transform_indices = @transform_5, window_bounds = array<i64: 1, 3, 256>}, {transform_indices = @transform_6, window_bounds = array<i64: 1, 1, 256>}]} {
    %c0 = arith.constant 0 : index
    %c0_0 = arith.constant 0 : index
    %c0_1 = arith.constant 0 : index
    %0 = vector.load %arg1[%c0, %c0_0, %c0_1] : memref<1x32x256xf32, #tpu.memory_space<vmem>>, vector<1x32x256xf32>
    %1 = vector.shape_cast %0 : vector<1x32x256xf32> to vector<32x256xf32>
    %c0_2 = arith.constant 0 : index
    %c0_3 = arith.constant 0 : index
    %c0_4 = arith.constant 0 : index
    %2 = vector.load %arg2[%c0_2, %c0_3, %c0_4] : memref<1x1x256xf32, #tpu.memory_space<vmem>>, vector<1x1x256xf32>
    %3 = vector.shape_cast %2 : vector<1x1x256xf32> to vector<1x256xf32>
    %4 = vector.broadcast %3 : vector<1x256xf32> to vector<32x256xf32>
    %5 = arith.mulf %1, %4 : vector<32x256xf32>
    %c0_5 = arith.constant 0 : index
    %c0_6 = arith.constant 0 : index
    %6 = vector.load %arg4[%c0_5, %c0_6] : memref<6x32xf32, #tpu.memory_space<vmem>>, vector<6x32xf32>
    %cst = arith.constant dense<0.000000e+00> : vector<6x256xf32>
    %7 = tpu.matmul %6, %5, %cst {dimension_numbers = #tpu.dot_dimension_numbers<[1], [0], [0], [1], [0, 0, 1, 1], [], []>} : vector<6x32xf32>, vector<32x256xf32>, vector<6x256xf32> -> vector<6x256xf32>
    %c0_7 = arith.constant 0 : index
    %c0_8 = arith.constant 0 : index
    %8 = vector.load %arg5[%c0_7, %c0_8] : memref<6x1xf32, #tpu.memory_space<vmem>>, vector<6x1xf32>
    %9 = vector.broadcast %8 : vector<6x1xf32> to vector<6x256xf32>
    %10 = arith.addf %7, %9 : vector<6x256xf32>
    %11 = vector.extract_strided_slice %10 {offsets = [0, 0], sizes = [3, 256], strides = [1, 1]} : vector<6x256xf32> to vector<3x256xf32>
    %12 = vector.extract_strided_slice %10 {offsets = [3, 0], sizes = [3, 256], strides = [1, 1]} : vector<6x256xf32> to vector<3x256xf32>
    %cst_9 = arith.constant 2.000000e+00 : f32
    %13 = vector.broadcast %cst_9 : f32 to vector<3x256xf32>
    %14 = arith.addf %12, %13 : vector<3x256xf32>
    %15 = arith.negf %14 : vector<3x256xf32>
    %16 = math.exp %15 : vector<3x256xf32>
    %cst_10 = arith.constant 1.000000e+00 : f32
    %17 = vector.broadcast %cst_10 : f32 to vector<3x256xf32>
    %18 = arith.addf %17, %16 : vector<3x256xf32>
    %19 = arith.divf %17, %18 : vector<3x256xf32>
    %cst_11 = arith.constant 9.99999974E-5 : f32
    %20 = vector.broadcast %cst_11 : f32 to vector<3x256xf32>
    %21 = arith.addf %19, %20 : vector<3x256xf32>
    %c0_12 = arith.constant 0 : index
    %c0_13 = arith.constant 0 : index
    %c0_14 = arith.constant 0 : index
    %22 = vector.load %arg3[%c0_12, %c0_13, %c0_14] : memref<1x3x256xf32, #tpu.memory_space<vmem>>, vector<1x3x256xf32>
    %23 = vector.shape_cast %22 : vector<1x3x256xf32> to vector<3x256xf32>
    %24 = arith.addf %23, %11 : vector<3x256xf32>
    %25 = arith.mulf %24, %21 : vector<3x256xf32>
    %c0_15 = arith.constant 0 : index
    %c0_16 = arith.constant 0 : index
    %c0_17 = arith.constant 0 : index
    %26 = vector.load %arg6[%c0_15, %c0_16, %c0_17] : memref<1x3x256xf32, #tpu.memory_space<vmem>>, vector<1x3x256xf32>
    %27 = vector.shape_cast %26 : vector<1x3x256xf32> to vector<3x256xf32>
    %28 = vector.shape_cast %25 : vector<3x256xf32> to vector<1x3x256xf32>
    tpu.vector_store %arg6[%c0_15, %c0_16, %c0_17], %28 {strides = array<i32>} : memref<1x3x256xf32, #tpu.memory_space<vmem>>, vector<1x3x256xf32>,
    %29 = math.log %21 : vector<3x256xf32>
    %cst_18 = arith.constant dense<0.000000e+00> : vector<256xf32>
    %30 = vector.multi_reduction <add>, %29, %cst_18 [0] : vector<3x256xf32> to vector<256xf32>
    %31 = vector.shape_cast %30 : vector<256xf32> to vector<1x256xf32>
    %c0_19 = arith.constant 0 : index
    %c0_20 = arith.constant 0 : index
    %c0_21 = arith.constant 0 : index
    %32 = vector.load %arg7[%c0_19, %c0_20, %c0_21] : memref<1x1x256xf32, #tpu.memory_space<vmem>>, vector<1x1x256xf32>
    %33 = vector.shape_cast %32 : vector<1x1x256xf32> to vector<1x256xf32>
    %34 = vector.shape_cast %31 : vector<1x256xf32> to vector<1x1x256xf32>
    tpu.vector_store %arg7[%c0_19, %c0_20, %c0_21], %34 {strides = array<i32>} : memref<1x1x256xf32, #tpu.memory_space<vmem>>, vector<1x1x256xf32>,
    return
  }
  func.func @transform_0(%arg0: i32) -> (i32, i32, i32) {
    %c0_i32 = arith.constant 0 : i32
    %c0_i32_0 = arith.constant 0 : i32
    %c0_i32_1 = arith.constant 0 : i32
    return %arg0, %c0_i32, %c0_i32_0 : i32, i32, i32
  }
  func.func @transform_1(%arg0: i32) -> (i32, i32, i32) {
    %c0_i32 = arith.constant 0 : i32
    %c0_i32_0 = arith.constant 0 : i32
    %c0_i32_1 = arith.constant 0 : i32
    return %arg0, %c0_i32, %c0_i32_0 : i32, i32, i32
  }
  func.func @transform_2(%arg0: i32) -> (i32, i32, i32) {
    %c0_i32 = arith.constant 0 : i32
    %c0_i32_0 = arith.constant 0 : i32
    %c0_i32_1 = arith.constant 0 : i32
    return %arg0, %c0_i32, %c0_i32_0 : i32, i32, i32
  }
  func.func @transform_3(%arg0: i32) -> (i32, i32) {
    %c0_i32 = arith.constant 0 : i32
    %c0_i32_0 = arith.constant 0 : i32
    %c0_i32_1 = arith.constant 0 : i32
    return %c0_i32, %c0_i32_0 : i32, i32
  }
  func.func @transform_4(%arg0: i32) -> (i32, i32) {
    %c0_i32 = arith.constant 0 : i32
    %c0_i32_0 = arith.constant 0 : i32
    %c0_i32_1 = arith.constant 0 : i32
    return %c0_i32, %c0_i32_0 : i32, i32
  }
  func.func @transform_5(%arg0: i32) -> (i32, i32, i32) {
    %c0_i32 = arith.constant 0 : i32
    %c0_i32_0 = arith.constant 0 : i32
    %c0_i32_1 = arith.constant 0 : i32
    return %arg0, %c0_i32, %c0_i32_0 : i32, i32, i32
  }
  func.func @transform_6(%arg0: i32) -> (i32, i32, i32) {
    %c0_i32 = arith.constant 0 : i32
    %c0_i32_0 = arith.constant 0 : i32
    %c0_i32_1 = arith.constant 0 : i32
    return %arg0, %c0_i32, %c0_i32_0 : i32, i32, i32
  }
}

</mosaic_0001>

<bundles_post_ra>
// kernel: _lambda_.6
= control target key start
LH: loop header
LB: loop body
LE: loop exit
PB: predicated region body
PF: predicated region fallthrough
CT: control target
= control target key end

     0   :  { %s1262_s13 = smov 0   ;;  %s1442_s0 = inlined_call_operand.vmem [shape: f32[2,32,256], index: 0, kind: input, shape index: {}]   ;;  %s1443_s1 = inlined_call_operand.vmem [shape: f32[32,32], index: 1, kind: input, shape index: {}]   ;;  %s1444_s2 = inlined_call_operand.vmem [shape: f32[32,1], index: 2, kind: input, shape index: {}]   ;;  %s1445_s3 = inlined_call_operand.vmem [shape: f32[32,32], index: 3, kind: input, shape index: {}]   ;;  %s1446_s4 = inlined_call_operand.vmem [shape: f32[32,1], index: 4, kind: input, shape index: {}]   ;;  %s1447_s5 = inlined_call_operand.vmem [shape: f32[2,32], index: 5, kind: input, shape index: {}]   ;;  %s1448_s6 = inlined_call_operand.vmem [shape: f32[2,1], index: 6, kind: input, shape index: {}]   ;;  %s1449_s7 = inlined_call_operand.vmem [shape: f32[32,2], index: 7, kind: input, shape index: {}]   ;;  %s1450_s8 = inlined_call_operand.vmem [shape: f32[32,1], index: 8, kind: input, shape index: {}]   ;;  %s1451_s9 = inlined_call_operand.vmem [shape: f32[2,32,256], index: 9, kind: output, shape index: {0}]   ;;  %s1452_s10 = inlined_call_operand.vmem [shape: f32[2,2,256], index: 10, kind: output, shape index: {1}]  }
   0x1 LB: > { %s1103_s14 = sadd.s32 4294967295, %s1202_s13   ;;  %p1107_p0 = scmp.ge.s32.totalorder %s1202_s13, 1  ;;  %s1202_s13 = sphi %s1262_s13, %s21_s13  }
   0x2   : > { %p315_p1 = scmp.lt.s32.totalorder %s1202_s13, 3 }
   0x4   : > { %p316_p2 = pnand %p1107_p0, %p315_p1 }
   0x5   : > { %p358_p3 = scmp.lt.s32.totalorder (!%p316_p2), %s1103_s14, 1 }
   0x6   : > { %319 = sbr.rel (%p316_p2) target bundleno = 1206 (0x4b6), region = 56 }
   0xb   : > { %v1204_v0 = vmov 0.0   ;;  %v374_v1 = vld [vmem:[%s1444_s2 + $0x8] sm:$0xff]  ;;  %v376_v2 = vld [vmem:[%s1444_s2 + $0x18] sm:$0xff]  ;;  %s1454_s14 = smov (!%p358_p3, %s1103_s14), 1  ;;  %v1205_v3 = vmov 0   ;;  %v373_v4 = vld [vmem:[%s1444_s2] sm:$0xff] }
   0xc   : > { %466 = vmatprep.mubr.f32.mxu0 %v1204_v0  ;;  %631 = vmatprep.mubr.f32.mxu1 %v1204_v0  ;;  %s1135_s19 = sshll.u32 %s1454_s14, 6  ;;  %v375_v5 = vld [vmem:[%s1444_s2 + $0x10] sm:$0xff]  ;;  %v534_v13 = vld [vmem:[%s1446_s4 + $0x18] sm:$0xff]  ;;  %v377_v16 = vld [vmem:[%s1443_s1] sm:$0xff]  ;;  %vm389_vm0 = vcmask 261120   ;;  %vm1206_vm1 = vmmov 0  }
   0xd   : > { %1179 = vset.pattern.permute.xlu1 %v1205_v3  ;;  %1178 = vset.pattern.permute.xlu0 %v1205_v3  ;;  %s362_s24 = scalar_lea.vmem %s1442_s0, %s1135_s19  ;;  %v533_v11 = vld [vmem:[%s1446_s4 + $0x10] sm:$0xff]  ;;  %v531_v17 = vld [vmem:[%s1446_s4] sm:$0xff]  ;;  %v532_v18 = vld [vmem:[%s1446_s4 + $0x8] sm:$0xff]  ;;  %vm693_vm2 = vcmask 7168   ;;  %vm807_vm3 = vcmask 15360   ;;  %vm820_vm4 = vcmask 1041408   ;;  %s367_s22 = scalar_lea.vmem %s1451_s9, %s1135_s19 }
   0xe   : > { %498 = vperm.xlu1 %1179, %v374_v1   ;;  %508 = vperm.xlu0 %1178, %v376_v2   ;;  %v388_v6 = vld [vmem:[%s362_s24 + $0x38] sm:$0xff]  ;;  %v387_v7 = vld [vmem:[%s362_s24 + $0x30] sm:$0xff]  ;;  %v386_v8 = vld [vmem:[%s362_s24 + $0x28] sm:$0xff]  ;;  %s1137_s19 = sshll.u32 %s1454_s14, 2  ;;  %vm1000_vm5 = vcmask 1040384  }
   0xf   : > { %426 = vmatprep.subr.mxu0 %v388_v6  ;;  %v385_v9 = vld [vmem:[%s362_s24 + $0x20] sm:$0xff]  ;;  %v384_v10 = vld [vmem:[%s362_s24 + $0x18] sm:$0xff]  ;;  %v383_v12 = vld [vmem:[%s362_s24 + $0x10] sm:$0xff]  ;;  %s372_s25 = scalar_lea.vmem %s1452_s10, %s1137_s19 }
  0x10   : > { %427 = vmatpush1.msra.mxu0 %v387_v7  ;;  %v382_v14 = vld [vmem:[%s362_s24 + $0x8] sm:$0xff]  ;;  %v381_v15 = vld [vmem:[%s362_s24] sm:$0xff]  ;;  %v379_v20 = vld [vmem:[%s1443_s1 + $0x10] sm:$0xff] }
  0x11   : > { %428 = vmatprep.subr.mxu0 %v386_v8  ;;  %v378_v19 = vld [vmem:[%s1443_s1 + $0x8] sm:$0xff]  ;;  %v380_v21 = vld [vmem:[%s1443_s1 + $0x18] sm:$0xff]  ;;  %v527_v50 = vld [vmem:[%s1445_s3] sm:$0xff] }
  0x12   : > { %493 = vperm.xlu1 %1179, %v373_v4   ;;  %503 = vperm.xlu0 %1178, %v375_v5   ;;  %v528_v51 = vld [vmem:[%s1445_s3 + $0x8] sm:$0xff]  ;;  %v529_v52 = vld [vmem:[%s1445_s3 + $0x10] sm:$0xff]  ;;  %v530_v53 = vld [vmem:[%s1445_s3 + $0x18] sm:$0xff] }
  0x13   : > { %429 = vmatpush1.msra.mxu0 %v385_v9 }
  0x14   : > { %430 = vmatprep.subr.mxu0 %v384_v10 }
  0x15   : > { %431 = vmatpush1.msra.mxu0 %v383_v12 }
  0x16   : > { %547 = vperm.xlu1 %1179, %v533_v11   ;;  %552 = vperm.xlu0 %1178, %v534_v13  }
  0x17   : > { %432 = vmatprep.subr.mxu0 %v382_v14 }
  0x18   : > { %433 = vmatpush1.msra.mxu0 %v381_v15 }
  0x19   : > { %1114 = vmatmul.mubr.msk.f32.vlgmr.msra.gmra.mxu0 %vm389_vm0, %v377_v16  ;;  %1148 = vmatprep.subr.mxu0 %v1204_v0 }
  0x1a   : > { %537 = vperm.xlu1 %1179, %v531_v17   ;;  %472 = vmatprep.mubr.f32.mxu0 %v1204_v0 }
  0x1b   : > { %542 = vperm.xlu0 %1178, %v532_v18  }
  0x1d   : > { %1115 = vmatmul.mubr.msk.f32.gmra.mxu0 %vm389_vm0, %v378_v19 }
  0x1e   : > { %478 = vmatprep.mubr.f32.mxu0 %v1204_v0 }
  0x21   : > { %1116 = vmatmul.mubr.msk.f32.gmra.mxu0 %vm389_vm0, %v379_v20 }
  0x22   : > { %484 = vmatprep.mubr.f32.mxu0 %v1204_v0 }
  0x25   : > { %1117 = vmatmul.mubr.msk.f32.gmra.mxu0 %vm389_vm0, %v380_v21 }
  0x26   : > { %1156 = vmatprep.mubr.msk.f32.mxu0 %vm1206_vm1, %v1204_v0 }
  0x89   : > { %v509_v26 = vpop.permute.xlu0 %508  ;;  %v499_v29 = vpop.permute.xlu1 %498 }
  0x8d   : > { %v504_v31 = vpop.permute.xlu0 %503  ;;  %v494_v37 = vpop.permute.xlu1 %493 }
  0x91   : > { %v553_v54 = vpop.permute.xlu0 %552  ;;  %v548_v62 = vpop.permute.xlu1 %547 }
  0x95   : > { %v538_v16 = vpop.permute.xlu1 %537 }
  0x96   : > { %v543_v57 = vpop.permute.xlu0 %542 }
  0xd9   : > { %v468_v22 = vpop.f32.mrf.mxu0 }
  0xda   : > { %v511_v44 = vadd.f32 %v494_v37, %v468_v22 }
  0xdb   : > { %v470_v23 = vpop.f32.mrf.mxu0 }
  0xdc   : > { %v512_v42 = vadd.f32 %v494_v37, %v470_v23  ;;  %v519_v49 = vmax.f32 %v511_v44, 0.0 }
  0xdd   : > { %v474_v24 = vpop.f32.mrf.mxu0 }
  0xde   : > { %v513_v40 = vadd.f32 %v499_v29, %v474_v24  ;;  %v520_v48 = vmax.f32 %v512_v42, 0.0 }
  0xdf   : > { %v476_v25 = vpop.f32.mrf.mxu0 }
  0xe0   : > { %v514_v38 = vadd.f32 %v499_v29, %v476_v25  ;;  %v521_v47 = vmax.f32 %v513_v40, 0.0  ;;  %v785_v29 = vld [vmem:[%s1450_s8 + $0x10] sm:$0xff] }
  0xe1   : > { %v480_v27 = vpop.f32.mrf.mxu0 }
  0xe2   : > { %v515_v36 = vadd.f32 %v504_v31, %v480_v27  ;;  %v522_v46 = vmax.f32 %v514_v38, 0.0  ;;  %v699_v27 = vld [vmem:[%s1448_s6] sm:$0x3] }
  0xe3   : > { %v482_v28 = vpop.f32.mrf.mxu0 }
  0xe4   : > { %v516_v34 = vadd.f32 %v504_v31, %v482_v28  ;;  %v523_v45 = vmax.f32 %v515_v36, 0.0  ;;  %v784_v28 = vld [vmem:[%s1450_s8 + $0x8] sm:$0xff]  ;;  %v786_v31 = vld [vmem:[%s1450_s8 + $0x18] sm:$0xff] }
  0xe5   : > { %v486_v30 = vpop.f32.mrf.mxu0 }
  0xe6   : > { %v517_v32 = vadd.f32 %v509_v26, %v486_v30  ;;  %v524_v43 = vmax.f32 %v516_v34, 0.0  ;;  %v783_v30 = vld [vmem:[%s1450_s8] sm:$0xff] }
  0xe7   : > { %v488_v33 = vpop.f32.mrf.mxu0 }
  0xe8   : > { %v518_v35 = vadd.f32 %v509_v26, %v488_v33  ;;  %v525_v41 = vmax.f32 %v517_v32, 0.0 }
  0xea   : > { %v526_v39 = vmax.f32 %v518_v35, 0.0 }
  0xec   : > { %591 = vmatprep.subr.mxu1 %v526_v39 }
  0xed   : > { %592 = vmatpush1.msra.mxu1 %v525_v41 }
  0xee   : > { %593 = vmatprep.subr.mxu1 %v524_v43 }
  0xef   : > { %594 = vmatpush1.msra.mxu1 %v523_v45 }
  0xf0   : > { %595 = vmatprep.subr.mxu1 %v522_v46 }
  0xf1   : > { %596 = vmatpush1.msra.mxu1 %v521_v47  ;;  %v698_v47 = vld [vmem:[%s1447_s5] sm:$0x3] }
  0xf2   : > { %597 = vmatprep.subr.mxu1 %v520_v48 }
  0xf3   : > { %598 = vmatpush1.msra.mxu1 %v519_v49  ;;  %v779_v49 = vld [vmem:[%s1449_s7] sm:$0xff] }
  0xf4   : > { %1118 = vmatmul.mubr.msk.f32.vlgmr.msra.gmra.mxu1 %vm389_vm0, %v527_v50 }
  0xf5   : > { %637 = vmatprep.mubr.f32.mxu1 %v1204_v0 }
  0xf8   : > { %1119 = vmatmul.mubr.msk.f32.gmra.mxu1 %vm389_vm0, %v528_v51 }
  0xf9   : > { %643 = vmatprep.mubr.f32.mxu1 %v1204_v0 }
  0xfc   : > { %1120 = vmatmul.mubr.msk.f32.gmra.mxu1 %vm389_vm0, %v529_v52 }
  0xfd   : > { %649 = vmatprep.mubr.f32.mxu1 %v1204_v0 }
 0x100   : > { %1121 = vmatmul.mubr.msk.f32.gmra.mxu1 %vm389_vm0, %v530_v53 }
 0x101   : > { %1161 = vmatprep.mubr.msk.f32.mxu1 %vm807_vm3, %v779_v49 }
 0x1b4   : > { %v633_v55 = vpop.f32.mrf.mxu1 }
 0x1b5   : > { %v634_v20 = vadd.f32 %v633_v55, %v538_v16  ;;  %v781_v55 = vld [vmem:[%s1449_s7 + $0x10] sm:$0xff] }
 0x1b6   : > { %v635_v56 = vpop.f32.mrf.mxu1 }
 0x1b7   : > { %v636_v17 = vadd.f32 %v635_v56, %v538_v16  ;;  %v1369_v24 = vmax.f32 %v634_v20, 0.0  ;;  %v782_v56 = vld [vmem:[%s1449_s7 + $0x18] sm:$0xff] }
 0x1b8   : > { %v639_v58 = vpop.f32.mrf.mxu1 }
 0x1b9   : > { %v640_v59 = vadd.f32 %v639_v58, %v543_v57  ;;  %v1363_v21 = vmax.f32 %v636_v17, 0.0 }
 0x1ba   : > { %v641_v60 = vpop.f32.mrf.mxu1 }
 0x1bb   : > { %v642_v61 = vadd.f32 %v641_v60, %v543_v57  ;;  %v1343_v1 = vmax.f32 %v640_v59, 0.0  ;;  %v664_v25 = vadd.f32 %v1363_v21, %v1369_v24  ;;  %v681_v26 = vmax.f32 %v1369_v24, %v1363_v21 }
 0x1bc   : > { %v645_v63 = vpop.f32.mrf.mxu1 }
 0x1bd   : > { %v1345_v2 = vmax.f32 %v642_v61, 0.0  ;;  %v646_v3 = vadd.f32 %v645_v63, %v548_v62 }
 0x1be   : > { %v647_v4 = vpop.f32.mrf.mxu1 }
 0x1bf   : > { %v648_v5 = vadd.f32 %v647_v4, %v548_v62  ;;  %v667_v6 = vadd.f32 %v1345_v2, %v1343_v1  ;;  %v1349_v8 = vmax.f32 %v646_v3, 0.0  ;;  %v684_v22 = vmax.f32 %v1343_v1, %v1345_v2 }
 0x1c0   : > { %v651_v7 = vpop.f32.mrf.mxu1 }
 0x1c1   : > { %v1351_v9 = vmax.f32 %v648_v5, 0.0  ;;  %v652_v10 = vadd.f32 %v651_v7, %v553_v54  ;;  %668 = vadd.xlane.f32.xlu0 %v667_v6 }
 0x1c2   : > { %v653_v11 = vpop.f32.mrf.mxu1 }
 0x1c3   : > { %v654_v12 = vadd.f32 %v653_v11, %v553_v54  ;;  %v670_v13 = vadd.f32 %v1351_v9, %v1349_v8  ;;  %v1355_v14 = vmax.f32 %v652_v10, 0.0  ;;  %v687_v18 = vmax.f32 %v1349_v8, %v1351_v9  ;;  %v780_v54 = vld [vmem:[%s1449_s7 + $0x8] sm:$0xff] }
 0x1c5   : > { %v1357_v15 = vmax.f32 %v654_v12, 0.0  ;;  %671 = vadd.xlane.f32.xlu1 %v670_v13 }
 0x1c7   : > { %v673_v19 = vadd.f32 %v1357_v15, %v1355_v14  ;;  %v690_v23 = vmax.f32 %v1355_v14, %v1357_v15 }
 0x1c9   : > { %688 = vmax.xlane.f32.xlu1 %v687_v18  ;;  %674 = vadd.xlane.f32.xlu0 %v673_v19 }
 0x1cd   : > { %685 = vmax.xlane.f32.xlu1 %v684_v22  ;;  %691 = vmax.xlane.f32.xlu0 %v690_v23 }
 0x1d1   : > { %665 = vadd.xlane.f32.xlu0 %v664_v25 }
 0x1d5   : > { %682 = vmax.xlane.f32.xlu0 %v681_v26 }
 0x1de   : > { %702 = vperm.xlu1 %1179, %v699_v27  }
 0x1e2   : > { %794 = vperm.xlu1 %1179, %v784_v28  }
 0x1e6   : > { %799 = vperm.xlu1 %1179, %v785_v29  }
 0x1eb   : > { %789 = vperm.xlu0 %1178, %v783_v30  }
 0x1ef   : > { %804 = vperm.xlu0 %1178, %v786_v31  }
 0x24a   : > { %v669_v32 = vpop.xlane.xlu0 %668 }
 0x24b   : > { %v678_v41 = vmul.f32 0.00390625, %v669_v32 }
 0x24e   : > { %v672_v33 = vpop.xlane.xlu1 %671 }
 0x24f   : > { %v679_v38 = vmul.f32 0.00390625, %v672_v33 }
 0x252   : > { %v689_v34 = vpop.xlane.xlu1 %688  ;;  %v675_v35 = vpop.xlane.xlu0 %674 }
 0x253   : > { %v680_v36 = vmul.f32 0.00390625, %v675_v35  ;;  %v696_v42 = vsel %vm693_vm2, %v679_v38, %v689_v34 }
 0x256   : > { %v692_v37 = vpop.xlane.xlu0 %691  ;;  %v686_v40 = vpop.xlane.xlu1 %685 }
 0x257   : > { %v697_v39 = vsel %vm693_vm2, %v680_v36, %v692_v37  ;;  %v695_v44 = vsel %vm693_vm2, %v678_v41, %v686_v40 }
 0x258   : > { %1149 = vmatpush3.msra.mxu0 %v697_v39 }
 0x259   : > { %1150 = vmatprep.subr.mxu0 %v1204_v0 }
 0x25a   : > { %1151 = vmatpush3.msra.mxu0 %v696_v42  ;;  %v666_v43 = vpop.xlane.xlu0 %665  ;;  %v703_v50 = vpop.permute.xlu1 %702 }
 0x25b   : > { %1152 = vmatprep.subr.mxu0 %v1204_v0  ;;  %v677_v45 = vmul.f32 0.00390625, %v666_v43 }
 0x25c   : > { %1153 = vmatpush3.msra.mxu0 %v695_v44 }
 0x25d   : > { %1154 = vmatprep.subr.mxu0 %v1204_v0 }
 0x25e   : > { %v683_v46 = vpop.xlane.xlu0 %682  ;;  %v795_v58 = vpop.permute.xlu1 %794 }
 0x25f   : > { %v694_v48 = vsel %vm693_vm2, %v677_v45, %v683_v46 }
 0x260   : > { %1155 = vmatpush3.msra.mxu0 %v694_v48 }
 0x261   : > { %1157 = vmatmul.mubr.msk.f32.vlgmr.msra.gmra.mxu0 %vm389_vm0, %v698_v47 }
 0x262   : > { %v800_v7 = vpop.permute.xlu1 %799 }
 0x266   : > { %v790_v57 = vpop.permute.xlu0 %789 }
 0x26a   : > { %v805_v3 = vpop.permute.xlu0 %804 }
 0x321   : > { %v774_v51 = vpop.f32.mrf.mxu0 }
 0x322   : > { %v775_v0 = vadd.f32 %v774_v51, %v703_v50 }
 0x323   : > { %v1158_v52 = vpop.f32.mrf.mxu0 }
 0x324   : > { %v778_v53 = vmax.f32 %v775_v0, 0.0 }
 0x326   : > { %1159 = vmatprep.subr.msk.mxu1 %vm820_vm4, %v778_v53 }
 0x327   : > { %1160 = vmatpush3.msk.msra.mxu1 %vm820_vm4, %v778_v53 }
 0x328   : > { %1162 = vmatmul.mubr.msk.f32.vlgmr.msra.gmra.mxu1 %vm807_vm3, %v780_v54 }
 0x329   : > { %1164 = vmatprep.mubr.msk.f32.mxu1 %vm807_vm3, %v781_v55 }
 0x32c   : > { %1165 = vmatmul.mubr.msk.f32.gmra.mxu1 %vm807_vm3, %v782_v56 }
 0x3e8   : > { %v1163_v59 = vpop.f32.mrf.mxu1 }
 0x3e9   : > { %v896_v60 = vadd.f32 %v1163_v59, %v795_v58 }
 0x3ea   : > { %v890_v61 = vpop.f32.mrf.mxu1 }
 0x3eb   : > { %v891_v62 = vadd.f32 %v890_v61, %v790_v57  ;;  %v912_v63 = vsel %vm807_vm3, %v896_v60, 0.0 }
 0x3ec   : > { %913 = vadd.xlane.f32.xlu0 %v912_v63  ;;  %v1166_v4 = vpop.f32.mrf.mxu1 }
 0x3ed   : > { %v906_v5 = vadd.f32 %v1166_v4, %v805_v3  ;;  %v909_v6 = vsel %vm807_vm3, %v891_v62, 0.0 }
 0x3ee   : > { %v900_v10 = vpop.f32.mrf.mxu1  ;;  %910 = vadd.xlane.f32.xlu1 %v909_v6 }
 0x3ef   : > { %v901_v11 = vadd.f32 %v900_v10, %v800_v7  ;;  %v918_v13 = vsel %vm807_vm3, %v906_v5, 0.0 }
 0x3f1   : > { %v915_v12 = vsel %vm807_vm3, %v901_v11, 0.0 }
 0x3f2   : > { %916 = vadd.xlane.f32.xlu0 %v915_v12  ;;  %919 = vadd.xlane.f32.xlu1 %v918_v13 }
 0x475   : > { %v914_v16 = vpop.xlane.xlu0 %913 }
 0x476   : > { %v1129_v17 = vmul.f32 -1.442695, %v914_v16 }
 0x477   : > { %v911_v18 = vpop.xlane.xlu1 %910 }
 0x478   : > { %1180 = vpow2.f32 %v1129_v17  ;;  %v1128_v19 = vmul.f32 -1.442695, %v911_v18 }
 0x47a   : > { %1182 = vpow2.f32 %v1128_v19 }
 0x47b   : > { %v920_v20 = vpop.xlane.xlu1 %919  ;;  %v917_v22 = vpop.xlane.xlu0 %916 }
 0x47c   : > { %v1131_v23 = vmul.f32 -1.442695, %v920_v20  ;;  %v1130_v25 = vmul.f32 -1.442695, %v917_v22 }
 0x47e   : > { %1184 = vpow2.f32 %v1131_v23 }
 0x47f   : > { %1186 = vpow2.f32 %v1130_v25 }
 0x485   : > { %v1181_v26 = vpop.eup %1180 }
 0x486   : > { %v934_v27 = vadd.f32 1.0, %v1181_v26 }
 0x487   : > { %v1183_v28 = vpop.eup %1182 }
 0x488   : > { %1188 = vrcp.f32 %v934_v27  ;;  %v933_v29 = vadd.f32 1.0, %v1183_v28 }
 0x48a   : > { %1190 = vrcp.f32 %v933_v29 }
 0x48b   : > { %v1185_v30 = vpop.eup %1184 }
 0x48c   : > { %v1187_v31 = vpop.eup %1186  ;;  %v936_v32 = vadd.f32 1.0, %v1185_v30 }
 0x48d   : > { %v935_v33 = vadd.f32 1.0, %v1187_v31 }
 0x48e   : > { %1192 = vrcp.f32 %v936_v32 }
 0x48f   : > { %1194 = vrcp.f32 %v935_v33 }
 0x495   : > { %v1189_v34 = vpop.eup %1188 }
 0x496   : > { %v947_v35 = vmul.f32 %v1189_v34, %v1343_v1  ;;  %v948_v36 = vmul.f32 %v1189_v34, %v1345_v2 }
 0x497   : > { %v1191_v37 = vpop.eup %1190 }
 0x498   : > { %955 = vst [vmem:[%s367_s22 + $0x10] sm:$0xff] %v947_v35  ;;  %956 = vst [vmem:[%s367_s22 + $0x18] sm:$0xff] %v948_v36  ;;  %v945_v38 = vmul.f32 %v1191_v37, %v1369_v24  ;;  %v946_v39 = vmul.f32 %v1191_v37, %v1363_v21 }
 0x49a   : > { %953 = vst [vmem:[%s367_s22] sm:$0xff] %v945_v38  ;;  %954 = vst [vmem:[%s367_s22 + $0x8] sm:$0xff] %v946_v39  ;;  %v979_v44 = vadd.f32 %v947_v35, %v945_v38  ;;  %v988_v45 = vadd.f32 %v948_v36, %v946_v39 }
 0x49b   : > { %v1193_v40 = vpop.eup %1192 }
 0x49c   : > { %v1195_v41 = vpop.eup %1194  ;;  %v951_v42 = vmul.f32 %v1193_v40, %v1355_v14  ;;  %v952_v43 = vmul.f32 %v1193_v40, %v1357_v15 }
 0x49d   : > { %v949_v1 = vmul.f32 %v1195_v41, %v1349_v8  ;;  %v950_v2 = vmul.f32 %v1195_v41, %v1351_v9 }
 0x49e   : > { %959 = vst [vmem:[%s367_s22 + $0x30] sm:$0xff] %v951_v42  ;;  %960 = vst [vmem:[%s367_s22 + $0x38] sm:$0xff] %v952_v43  ;;  %v962_v46 = vmax.f32 %v947_v35, %v951_v42  ;;  %v971_v24 = vmax.f32 %v948_v36, %v952_v43 }
 0x49f   : > { %957 = vst [vmem:[%s367_s22 + $0x20] sm:$0xff] %v949_v1  ;;  %958 = vst [vmem:[%s367_s22 + $0x28] sm:$0xff] %v950_v2  ;;  %v961_v21 = vmax.f32 %v945_v38, %v949_v1  ;;  %v970_v47 = vmax.f32 %v946_v39, %v950_v2  ;;  %v980_v48 = vadd.f32 %v979_v44, %v949_v1 }
 0x4a0   : > { %v989_v49 = vadd.f32 %v988_v45, %v950_v2 }
 0x4a1   : > { %v963_v50 = vmax.f32 %v961_v21, %v962_v46  ;;  %v972_v14 = vmax.f32 %v970_v47, %v971_v24  ;;  %v981_v51 = vadd.f32 %v980_v48, %v951_v42 }
 0x4a2   : > { %v990_v15 = vadd.f32 %v989_v49, %v952_v43 }
 0x4a3   : > { %v964_v0 = vrot.slane %v963_v50, 4  ;;  %v973_v52 = vrot.slane %v972_v14, 4  ;;  %v982_v53 = vrot.slane %v981_v51, 4 }
 0x4a4   : > { %v991_v8 = vrot.slane %v990_v15, 4 }
 0x4a5   : > { %v965_v54 = vmax.f32 %v963_v50, %v964_v0  ;;  %v974_v9 = vmax.f32 %v972_v14, %v973_v52  ;;  %v983_v55 = vadd.f32 %v982_v53, %v981_v51 }
 0x4a6   : > { %v992_v56 = vadd.f32 %v991_v8, %v990_v15 }
 0x4a7   : > { %v966_v57 = vrot.slane %v965_v54, 2  ;;  %v975_v58 = vrot.slane %v974_v9, 2  ;;  %v984_v59 = vrot.slane %v983_v55, 2 }
 0x4a8   : > { %v993_v60 = vrot.slane %v992_v56, 2 }
 0x4a9   : > { %v967_v61 = vmax.f32 %v965_v54, %v966_v57  ;;  %v976_v62 = vmax.f32 %v974_v9, %v975_v58  ;;  %v985_v63 = vadd.f32 %v984_v59, %v983_v55 }
 0x4aa   : > { %v994_v3 = vadd.f32 %v993_v60, %v992_v56 }
 0x4ab   : > { %v968_v4 = vrot.slane %v967_v61, 1  ;;  %v977_v5 = vrot.slane %v976_v62, 1  ;;  %v986_v6 = vrot.slane %v985_v63, 1 }
 0x4ac   : > { %v995_v7 = vrot.slane %v994_v3, 1 }
 0x4ad   : > { %v987_v10 = vadd.f32 %v986_v6, %v985_v63  ;;  %v969_v12 = vmax.f32 %v967_v61, %v968_v4  ;;  %v978_v13 = vmax.f32 %v976_v62, %v977_v5 }
 0x4ae   : > { %v996_v11 = vadd.f32 %v995_v7, %v994_v3 }
 0x4af   : > { %v998_v16 = vmul.f32 0.03125, %v987_v10 }
 0x4b0   : > { %v999_v17 = vmul.f32 0.03125, %v996_v11 }
 0x4b1   : > { %v1001_v18 = vsel %vm1000_vm5, %v969_v12, %v998_v16 }
 0x4b2   : > { %v1002_v19 = vsel %vm1000_vm5, %v978_v13, %v999_v17 }
 0x4b3   : > { %v1005_v20 = vcombine.low %v1001_v18, %v1002_v19 }
 0x4b5   : > { %1132 = vst.sshfl [vmem:[%s372_s25] sm:$0x33 pattern:$0x76325410] %v1005_v20 }
 0x4b6 PF: > { %s21_s13 = sadd.s32 1, %s1202_s13  }
 0x4b7   : > { %p18_p4 = scmp.ge.s32.totalorder %s21_s13, 4  }
 0x4b9   :  { %20 = sbr.rel (!%p18_p4) target bundleno = 1 (0x1), region = 98 }

// kernel: _lambda_.7
= control target key start
LH: loop header
LB: loop body
LE: loop exit
PB: predicated region body
PF: predicated region fallthrough
CT: control target
= control target key end

     0   :  { %s687_s21 = smov 0   ;;  %s735_s0 = inlined_call_operand.vmem [shape: f32[2,32,256], index: 0, kind: input, shape index: {}]   ;;  %s736_s1 = inlined_call_operand.vmem [shape: f32[2,1,256], index: 1, kind: input, shape index: {}]   ;;  %s737_s2 = inlined_call_operand.vmem [shape: f32[2,4,256], index: 2, kind: input, shape index: {}]   ;;  %s738_s3 = inlined_call_operand.vmem [shape: f32[8,32], index: 3, kind: input, shape index: {}]   ;;  %s739_s4 = inlined_call_operand.vmem [shape: f32[8,1], index: 4, kind: input, shape index: {}]   ;;  %s740_s5 = inlined_call_operand.vmem [shape: f32[2,4,256], index: 5, kind: output, shape index: {0}]   ;;  %s741_s6 = inlined_call_operand.vmem [shape: f32[2,1,256], index: 6, kind: output, shape index: {1}]  }
   0x1 LB: > { %s596_s22 = sadd.s32 4294967295, %s647_s21   ;;  %p600_p0 = scmp.ge.s32.totalorder %s647_s21, 1  ;;  %s647_s21 = sphi %s687_s21, %s17_s21  }
   0x2   : > { %p234_p1 = scmp.lt.s32.totalorder %s647_s21, 3 }
   0x4   : > { %p235_p2 = pnand %p600_p0, %p234_p1 }
   0x5   : > { %p277_p3 = scmp.lt.s32.totalorder (!%p235_p2), %s596_s22, 1 }
   0x6   : > { %238 = sbr.rel (%p235_p2) target bundleno = 300 (0x12c), region = 40 }
   0xb   : > { %v310_v0 = vlaneseq  ;;  %v649_v1 = vmov 0.0   ;;  %v329_v2 = vld [vmem:[%s739_s4] sm:$0xff]  ;;  %s743_s22 = smov (!%p277_p3, %s596_s22), 1  ;;  %v650_v4 = vmov 0   ;;  %vm335_vm0 = vcmask 261120  }
   0xc   : > { %403 = vmatprep.mubr.f32.mxu0 %v649_v1  ;;  %628 = vset.pattern.permute.xlu0 %v650_v4  ;;  %s614_s25 = sshll.u32 %s743_s22, 6  ;;  %s603_s26 = sshll.u32 %s743_s22, 1  ;;  %v328_v26 = vld [vmem:[%s738_s3] sm:$0xff]  ;;  %vm448_vm1 = vcmask 1043456   ;;  %v651_v60 = vmov 1966171168  }
   0xd   : > { %v701_v3 = vshrl.u32 %v310_v0, 7  ;;  %332 = vperm.xlu0 %628, %v329_v2   ;;  %s281_s29 = scalar_lea.vmem %s735_s0, %s614_s25  ;;  %s285_s8 = scalar_lea.vmem %s736_s1, %s603_s26  ;;  %v467_v61 = vunpack.c.l.s4 %v651_v60  ;;  %vm483_vm2 = vcmp.lt.s32.totalorder %v310_v0, 256 }
   0xe   : > { %v307_v7 = vld [vmem:[%s281_s29 + $0x38] sm:$0xff]  ;;  %v308_v8 = vld [vmem:[%s285_s8] sm:$0x3]  ;;  %v306_v9 = vld [vmem:[%s281_s29 + $0x30] sm:$0xff]  ;;  %s615_s11 = sshll.u32 %s743_s22, 3  ;;  %s299_s20 = scalar_lea.vmem %s741_s6, %s603_s26 }
   0xf   : > { %v316_v5 = vsub.s32 1, %v701_v3  ;;  %v312_v6 = vsub.s32 0, %v701_v3  ;;  %v305_v12 = vld [vmem:[%s281_s29 + $0x28] sm:$0xff]  ;;  %v304_v13 = vld [vmem:[%s281_s29 + $0x20] sm:$0xff]  ;;  %v303_v14 = vld [vmem:[%s281_s29 + $0x18] sm:$0xff]  ;;  %s290_s14 = scalar_lea.vmem %s737_s2, %s615_s11  ;;  %s295_s17 = scalar_lea.vmem %s740_s5, %s615_s11  ;;  %v468_v4 = vunpack.c.0.s8 %v467_v61 }
  0x10   : > { %v302_v18 = vld [vmem:[%s281_s29 + $0x10] sm:$0xff]  ;;  %v301_v20 = vld [vmem:[%s281_s29 + $0x8] sm:$0xff]  ;;  %v300_v22 = vld [vmem:[%s281_s29] sm:$0xff] }
  0x11   : > { %v317_v10 = vrot.slane %v308_v8, %v316_v5  ;;  %v313_v11 = vrot.slane %v308_v8, %v312_v6  ;;  %v426_v44 = vld [vmem:[%s290_s14] sm:$0xff]  ;;  %v471_v8 = vsub.s32 %v468_v4, %v701_v3 }
  0x13   : > { %v327_v15 = vmul.f32 %v317_v10, %v307_v7  ;;  %v326_v16 = vmul.f32 %v313_v11, %v306_v9  ;;  %v325_v17 = vmul.f32 %v317_v10, %v305_v12  ;;  %v324_v19 = vmul.f32 %v313_v11, %v304_v13 }
  0x14   : > { %v323_v21 = vmul.f32 %v317_v10, %v303_v14  ;;  %v322_v23 = vmul.f32 %v313_v11, %v302_v18  ;;  %v321_v24 = vmul.f32 %v317_v10, %v301_v20  ;;  %v320_v25 = vmul.f32 %v313_v11, %v300_v22 }
  0x15   : > { %363 = vmatprep.subr.mxu0 %v327_v15 }
  0x16   : > { %364 = vmatpush1.msra.mxu0 %v326_v16 }
  0x17   : > { %365 = vmatprep.subr.mxu0 %v325_v17 }
  0x18   : > { %366 = vmatpush1.msra.mxu0 %v324_v19 }
  0x19   : > { %367 = vmatprep.subr.mxu0 %v323_v21 }
  0x1a   : > { %368 = vmatpush1.msra.mxu0 %v322_v23 }
  0x1b   : > { %369 = vmatprep.subr.mxu0 %v321_v24 }
  0x1c   : > { %370 = vmatpush1.msra.mxu0 %v320_v25 }
  0x1d   : > { %609 = vmatmul.mubr.msk.f32.vlgmr.msra.gmra.mxu0 %vm335_vm0, %v328_v26 }
  0x88   : > { %v333_v27 = vpop.permute.xlu0 %332 }
  0xdd   : > { %v405_v28 = vpop.f32.mrf.mxu0 }
  0xde   : > { %v406_v29 = vadd.f32 %v405_v28, %v333_v27 }
  0xdf   : > { %v407_v30 = vpop.f32.mrf.mxu0 }
  0xe0   : > { %v410_v31 = vadd.f32 2.0, %v406_v29  ;;  %v408_v32 = vadd.f32 %v407_v30, %v333_v27 }
  0xe2   : > { %v610_v33 = vmul.f32 -1.442695, %v410_v31  ;;  %v411_v34 = vadd.f32 2.0, %v408_v32  ;;  %v429_v42 = vcombine.low %v406_v29, %v408_v32 }
  0xe4   : > { %629 = vpow2.f32 %v610_v33  ;;  %v611_v35 = vmul.f32 -1.442695, %v411_v34  ;;  %v431_v46 = vadd.f32 %v429_v42, %v426_v44 }
  0xe6   : > { %631 = vpow2.f32 %v611_v35 }
  0xf1   : > { %v630_v36 = vpop.eup %629 }
  0xf2   : > { %v418_v37 = vadd.f32 1.0, %v630_v36 }
  0xf3   : > { %v632_v38 = vpop.eup %631 }
  0xf4   : > { %633 = vrcp.f32 %v418_v37  ;;  %v419_v39 = vadd.f32 1.0, %v632_v38 }
  0xf6   : > { %635 = vrcp.f32 %v419_v39 }
 0x101   : > { %v634_v40 = vpop.eup %633 }
 0x102   : > { %v424_v41 = vadd.f32 0.0001, %v634_v40 }
 0x103   : > { %v636_v43 = vpop.eup %635 }
 0x104   : > { %v425_v45 = vadd.f32 0.0001, %v636_v43  ;;  %637 = vlog2.f32 %v424_v41 }
 0x106   : > { %v434_v47 = vcombine.high %v424_v41, %v425_v45  ;;  %639 = vlog2.f32 %v425_v45 }
 0x108   : > { %v436_v48 = vmul.f32 %v434_v47, %v431_v46 }
 0x10a   : > { %437 = vst [vmem:[%s295_s17] sm:$0xff] %v436_v48 }
 0x111   : > { %v638_v49 = vpop.eup %637 }
 0x112   : > { %v439_v50 = vmul.f32 0.6931472, %v638_v49 }
 0x113   : > { %v640_v51 = vpop.eup %639 }
 0x114   : > { %v441_v52 = vmul.f32 0.6931472, %v640_v51  ;;  %v444_v53 = vrot.slane %v439_v50, 4 }
 0x116   : > { %v445_v54 = vrot.slane %v441_v52, 4  ;;  %v449_v55 = vsel %vm448_vm1, %v444_v53, 0.0 }
 0x117   : > { %v450_v56 = vrot.slane %v449_v55, 4 }
 0x118   : > { %v456_v57 = vsel %vm448_vm1, %v445_v54, 0.0 }
 0x119   : > { %v451_v58 = vadd.f32 %v450_v56, %v449_v55  ;;  %v457_v59 = vrot.slane %v456_v57, 4 }
 0x11b   : > { %v452_v62 = vrot.slane %v451_v58, 2  ;;  %v458_v63 = vadd.f32 %v457_v59, %v456_v57 }
 0x11d   : > { %v453_v1 = vadd.f32 %v452_v62, %v451_v58  ;;  %v459_v2 = vrot.slane %v458_v63, 2 }
 0x11f   : > { %v454_v5 = vrot.slane %v453_v1, 1  ;;  %v460_v6 = vadd.f32 %v459_v2, %v458_v63 }
 0x121   : > { %v461_v7 = vrot.slane %v460_v6, 1  ;;  %v455_v9 = vadd.f32 %v454_v5, %v453_v1 }
 0x123   : > { %v462_v10 = vadd.f32 %v461_v7, %v460_v6 }
 0x125   : > { %v465_v11 = vcombine.low %v455_v9, %v462_v10 }
 0x127   : > { %v472_v12 = vrot.slane %v465_v11, %v471_v8 }
 0x129   : > { %v479_v13 = vrot.slane %v472_v12, %v471_v8 }
 0x12b   : > { %485 = vst.msk [vmem:[%s299_s20] sm:$0x3] %vm483_vm2, %v479_v13 }
 0x12c PF: > { %s17_s21 = sadd.s32 1, %s647_s21  }
 0x12d   : > { %p14_p4 = scmp.ge.s32.totalorder %s17_s21, 4  }
 0x12f   :  { %16 = sbr.rel (!%p14_p4) target bundleno = 1 (0x1), region = 88 }

// kernel: _lambda_.8
= control target key start
LH: loop header
LB: loop body
LE: loop exit
PB: predicated region body
PF: predicated region fallthrough
CT: control target
= control target key end

     0   :  { %s1489_s21 = smov 0   ;;  %s1697_s0 = inlined_call_operand.vmem [shape: f32[2,1,256], index: 0, kind: input, shape index: {}]   ;;  %s1698_s1 = inlined_call_operand.vmem [shape: f32[2,32,256], index: 1, kind: input, shape index: {}]   ;;  %s1699_s2 = inlined_call_operand.vmem [shape: f32[32,1], index: 2, kind: input, shape index: {}]   ;;  %s1700_s3 = inlined_call_operand.vmem [shape: f32[32,32], index: 3, kind: input, shape index: {}]   ;;  %s1701_s4 = inlined_call_operand.vmem [shape: f32[32,1], index: 4, kind: input, shape index: {}]   ;;  %s1702_s5 = inlined_call_operand.vmem [shape: f32[32,32], index: 5, kind: input, shape index: {}]   ;;  %s1703_s6 = inlined_call_operand.vmem [shape: f32[32,1], index: 6, kind: input, shape index: {}]   ;;  %s1704_s7 = inlined_call_operand.vmem [shape: f32[2,32], index: 7, kind: input, shape index: {}]   ;;  %s1705_s8 = inlined_call_operand.vmem [shape: f32[2,1], index: 8, kind: input, shape index: {}]   ;;  %s1706_s9 = inlined_call_operand.vmem [shape: f32[32,2], index: 9, kind: input, shape index: {}]   ;;  %s1707_s10 = inlined_call_operand.vmem [shape: f32[32,1], index: 10, kind: input, shape index: {}]   ;;  %s1708_s11 = inlined_call_operand.vmem [shape: f32[2,32,256], index: 11, kind: output, shape index: {0}]   ;;  %s1709_s12 = inlined_call_operand.vmem [shape: f32[2,2,256], index: 12, kind: output, shape index: {1}]  }
   0x1 LB: > { %s1313_s22 = sadd.s32 4294967295, %s1419_s21   ;;  %p1317_p0 = scmp.ge.s32.totalorder %s1419_s21, 1  ;;  %s1419_s21 = sphi %s1489_s21, %s23_s21  }
   0x2   : > { %p374_p1 = scmp.lt.s32.totalorder %s1419_s21, 3 }
   0x4   : > { %p375_p2 = pnand %p1317_p0, %p374_p1 }
   0x5   : > { %p425_p3 = scmp.lt.s32.totalorder (!%p375_p2), %s1313_s22, 1 }
   0x6   : > { %378 = sbr.rel (%p375_p2) target bundleno = 1205 (0x4b5), region = 64 }
   0xb   : > { %v454_v0 = vlaneseq  ;;  %v1421_v1 = vmov 0.0   ;;  %s1711_s22 = smov (!%p425_p3, %s1313_s22), 1  ;;  %v1422_v3 = vmov 0   ;;  %v445_v4 = vld [vmem:[%s1701_s4 + $0x8] sm:$0xff]  ;;  %v447_v5 = vld [vmem:[%s1701_s4 + $0x18] sm:$0xff]  ;;  %v444_v8 = vld [vmem:[%s1701_s4] sm:$0xff] }
   0xc   : > { %544 = vmatprep.mubr.f32.mxu0 %v1421_v1  ;;  %686 = vmatprep.mubr.f32.mxu1 %v1421_v1  ;;  %s1352_s27 = sshll.u32 %s1711_s22, 6  ;;  %v446_v9 = vld [vmem:[%s1701_s4 + $0x10] sm:$0xff]  ;;  %s1318_s17 = sshll.u32 %s1711_s22, 1  ;;  %vm475_vm0 = vcmask 1040384   ;;  %v448_v19 = vld [vmem:[%s1699_s2] sm:$0xff]  ;;  %vm462_vm1 = vcmask 7168  }
   0xd   : > { %v455_v2 = vshrl.u32 %v454_v0, 7  ;;  %1396 = vset.pattern.permute.xlu1 %v1422_v3  ;;  %1395 = vset.pattern.permute.xlu0 %v1422_v3  ;;  %s433_s30 = scalar_lea.vmem %s1698_s1, %s1352_s27  ;;  %s428_s20 = scalar_lea.vmem %s1697_s0, %s1318_s17  ;;  %v597_v22 = vld [vmem:[%s1700_s3] sm:$0xff]  ;;  %vm609_vm2 = vcmask 261120   ;;  %v734_v23 = vld [vmem:[%s1703_s6 + $0x18] sm:$0xff]  ;;  %v733_v24 = vld [vmem:[%s1703_s6 + $0x10] sm:$0xff]  ;;  %vm1423_vm3 = vmmov 0  }
   0xe   : > { %576 = vperm.xlu1 %1396, %v445_v4   ;;  %586 = vperm.xlu0 %1395, %v447_v5   ;;  %v608_v10 = vld [vmem:[%s433_s30 + $0x38] sm:$0xff]  ;;  %v607_v11 = vld [vmem:[%s433_s30 + $0x30] sm:$0xff]  ;;  %v606_v12 = vld [vmem:[%s433_s30 + $0x28] sm:$0xff]  ;;  %vm1006_vm4 = vcmask 15360   ;;  %vm1019_vm5 = vcmask 1041408   ;;  %s438_s15 = scalar_lea.vmem %s1708_s11, %s1352_s27  ;;  %s1354_s27 = sshll.u32 %s1711_s22, 2 }
   0xf   : > { %v456_v6 = vsub.s32 0, %v455_v2  ;;  %v460_v7 = vsub.s32 1, %v455_v2  ;;  %646 = vmatprep.subr.mxu1 %v608_v10  ;;  %v605_v13 = vld [vmem:[%s433_s30 + $0x20] sm:$0xff]  ;;  %v604_v15 = vld [vmem:[%s433_s30 + $0x18] sm:$0xff]  ;;  %v603_v18 = vld [vmem:[%s433_s30 + $0x10] sm:$0xff]  ;;  %s443_s18 = scalar_lea.vmem %s1709_s12, %s1354_s27 }
  0x10   : > { %647 = vmatpush1.msra.mxu1 %v607_v11  ;;  %v452_v14 = vld [vmem:[%s428_s20] sm:$0x3]  ;;  %v602_v20 = vld [vmem:[%s433_s30 + $0x8] sm:$0xff]  ;;  %v450_v29 = vld [vmem:[%s1699_s2 + $0x10] sm:$0xff] }
  0x11   : > { %v457_v16 = vrot.slane %v452_v14, %v456_v6  ;;  %v461_v17 = vrot.slane %v452_v14, %v460_v7  ;;  %648 = vmatprep.subr.mxu1 %v606_v12  ;;  %v601_v21 = vld [vmem:[%s433_s30] sm:$0xff]  ;;  %v449_v25 = vld [vmem:[%s1699_s2 + $0x8] sm:$0xff]  ;;  %v599_v30 = vld [vmem:[%s1700_s3 + $0x10] sm:$0xff] }
  0x12   : > { %571 = vperm.xlu1 %1396, %v444_v8   ;;  %581 = vperm.xlu0 %1395, %v446_v9   ;;  %v598_v26 = vld [vmem:[%s1700_s3 + $0x8] sm:$0xff]  ;;  %v731_v28 = vld [vmem:[%s1703_s6] sm:$0xff]  ;;  %v451_v31 = vld [vmem:[%s1699_s2 + $0x18] sm:$0xff] }
  0x13   : > { %649 = vmatpush1.msra.mxu1 %v605_v13  ;;  %1325 = vmatprep.subr.msk.mxu0 %vm475_vm0, %v461_v17  ;;  %v732_v27 = vld [vmem:[%s1703_s6 + $0x8] sm:$0xff]  ;;  %v600_v32 = vld [vmem:[%s1700_s3 + $0x18] sm:$0xff]  ;;  %v727_v14 = vld [vmem:[%s1702_s5] sm:$0xff] }
  0x14   : > { %650 = vmatprep.subr.mxu1 %v604_v15  ;;  %1326 = vmatpush1.msk.msra.mxu0 %vm475_vm0, %v457_v16  ;;  %v728_v15 = vld [vmem:[%s1702_s5 + $0x8] sm:$0xff]  ;;  %v729_v16 = vld [vmem:[%s1702_s5 + $0x10] sm:$0xff]  ;;  %v730_v17 = vld [vmem:[%s1702_s5 + $0x18] sm:$0xff] }
  0x15   : > { %651 = vmatpush1.msra.mxu1 %v603_v18  ;;  %1327 = vmatmul.mubr.msk.f32.vlgmr.msra.gmra.mxu0 %vm462_vm1, %v448_v19 }
  0x16   : > { %652 = vmatprep.subr.mxu1 %v602_v20  ;;  %550 = vmatprep.mubr.f32.mxu0 %v1421_v1 }
  0x17   : > { %653 = vmatpush1.msra.mxu1 %v601_v21  ;;  %752 = vperm.xlu0 %1395, %v734_v23  }
  0x18   : > { %1331 = vmatmul.mubr.msk.f32.vlgmr.msra.gmra.mxu1 %vm609_vm2, %v597_v22  ;;  %747 = vperm.xlu1 %1396, %v733_v24  }
  0x19   : > { %692 = vmatprep.mubr.f32.mxu1 %v1421_v1  ;;  %1328 = vmatmul.mubr.msk.f32.gmra.mxu0 %vm462_vm1, %v449_v25 }
  0x1a   : > { %1365 = vmatprep.subr.mxu1 %v1421_v1  ;;  %556 = vmatprep.mubr.f32.mxu0 %v1421_v1 }
  0x1b   : > { %742 = vperm.xlu0 %1395, %v732_v27  }
  0x1c   : > { %1332 = vmatmul.mubr.msk.f32.gmra.mxu1 %vm609_vm2, %v598_v26  ;;  %737 = vperm.xlu1 %1396, %v731_v28  }
  0x1d   : > { %698 = vmatprep.mubr.f32.mxu1 %v1421_v1  ;;  %1329 = vmatmul.mubr.msk.f32.gmra.mxu0 %vm462_vm1, %v450_v29 }
  0x1e   : > { %562 = vmatprep.mubr.f32.mxu0 %v1421_v1 }
  0x20   : > { %1333 = vmatmul.mubr.msk.f32.gmra.mxu1 %vm609_vm2, %v599_v30 }
  0x21   : > { %704 = vmatprep.mubr.f32.mxu1 %v1421_v1  ;;  %1330 = vmatmul.mubr.msk.f32.gmra.mxu0 %vm462_vm1, %v451_v31 }
  0x22   : > { %831 = vmatprep.mubr.f32.mxu0 %v1421_v1 }
  0x24   : > { %1334 = vmatmul.mubr.msk.f32.gmra.mxu1 %vm609_vm2, %v600_v32 }
  0x25   : > { %1373 = vmatprep.mubr.msk.f32.mxu1 %vm1423_vm3, %v1421_v1 }
  0x89   : > { %v587_v40 = vpop.permute.xlu0 %586  ;;  %v577_v43 = vpop.permute.xlu1 %576 }
  0x8d   : > { %v582_v48 = vpop.permute.xlu0 %581  ;;  %v572_v53 = vpop.permute.xlu1 %571 }
  0x92   : > { %v753_v18 = vpop.permute.xlu0 %752 }
  0x93   : > { %v748_v26 = vpop.permute.xlu1 %747 }
  0x96   : > { %v743_v21 = vpop.permute.xlu0 %742 }
  0xd5   : > { %v546_v33 = vpop.f32.mrf.mxu0 }
  0xd6   : > { %v589_v62 = vadd.f32 %v572_v53, %v546_v33 }
  0xd7   : > { %v548_v34 = vpop.f32.mrf.mxu0 }
  0xd8   : > { %v688_v35 = vpop.f32.mrf.mxu1  ;;  %v590_v0 = vadd.f32 %v572_v53, %v548_v34 }
  0xd9   : > { %v552_v36 = vpop.f32.mrf.mxu0  ;;  %v711_v8 = vadd.f32 %v688_v35, %v589_v62 }
  0xda   : > { %v690_v37 = vpop.f32.mrf.mxu1  ;;  %v591_v56 = vadd.f32 %v577_v43, %v552_v36 }
  0xdb   : > { %v554_v38 = vpop.f32.mrf.mxu0  ;;  %v712_v6 = vadd.f32 %v690_v37, %v590_v0  ;;  %v719_v13 = vmax.f32 %v711_v8, 0.0 }
  0xdc   : > { %v694_v39 = vpop.f32.mrf.mxu1  ;;  %v592_v59 = vadd.f32 %v577_v43, %v554_v38  ;;  %v738_v43 = vpop.permute.xlu1 %737 }
  0xdd   : > { %v558_v41 = vpop.f32.mrf.mxu0  ;;  %v713_v4 = vadd.f32 %v694_v39, %v591_v56  ;;  %v720_v12 = vmax.f32 %v712_v6, 0.0  ;;  %v984_v56 = vld [vmem:[%s1707_s10 + $0x10] sm:$0xff] }
  0xde   : > { %v696_v42 = vpop.f32.mrf.mxu1  ;;  %v593_v50 = vadd.f32 %v582_v48, %v558_v41 }
  0xdf   : > { %v560_v44 = vpop.f32.mrf.mxu0  ;;  %v714_v2 = vadd.f32 %v696_v42, %v592_v59  ;;  %v721_v11 = vmax.f32 %v713_v4, 0.0 }
  0xe0   : > { %v700_v45 = vpop.f32.mrf.mxu1  ;;  %v594_v54 = vadd.f32 %v582_v48, %v560_v44 }
  0xe1   : > { %v564_v46 = vpop.f32.mrf.mxu0  ;;  %v715_v63 = vadd.f32 %v700_v45, %v593_v50  ;;  %v722_v10 = vmax.f32 %v714_v2, 0.0 }
  0xe2   : > { %v702_v47 = vpop.f32.mrf.mxu1  ;;  %v595_v49 = vadd.f32 %v587_v40, %v564_v46 }
  0xe3   : > { %v566_v51 = vpop.f32.mrf.mxu0  ;;  %v716_v60 = vadd.f32 %v702_v47, %v594_v54  ;;  %v723_v9 = vmax.f32 %v715_v63, 0.0  ;;  %v898_v54 = vld [vmem:[%s1705_s8] sm:$0x3] }
  0xe4   : > { %v706_v52 = vpop.f32.mrf.mxu1  ;;  %v596_v55 = vadd.f32 %v587_v40, %v566_v51 }
  0xe5   : > { %v717_v57 = vadd.f32 %v706_v52, %v595_v49  ;;  %v724_v7 = vmax.f32 %v716_v60, 0.0 }
  0xe6   : > { %v708_v58 = vpop.f32.mrf.mxu1 }
  0xe7   : > { %v718_v61 = vadd.f32 %v708_v58, %v596_v55  ;;  %v725_v5 = vmax.f32 %v717_v57, 0.0  ;;  %v983_v55 = vld [vmem:[%s1707_s10 + $0x8] sm:$0xff]  ;;  %v982_v57 = vld [vmem:[%s1707_s10] sm:$0xff]  ;;  %v985_v58 = vld [vmem:[%s1707_s10 + $0x18] sm:$0xff] }
  0xe9   : > { %v726_v3 = vmax.f32 %v718_v61, 0.0 }
  0xeb   : > { %791 = vmatprep.subr.mxu0 %v726_v3 }
  0xec   : > { %792 = vmatpush1.msra.mxu0 %v725_v5 }
  0xed   : > { %793 = vmatprep.subr.mxu0 %v724_v7 }
  0xee   : > { %794 = vmatpush1.msra.mxu0 %v723_v9 }
  0xef   : > { %795 = vmatprep.subr.mxu0 %v722_v10 }
  0xf0   : > { %796 = vmatpush1.msra.mxu0 %v721_v11  ;;  %v897_v11 = vld [vmem:[%s1704_s7] sm:$0x3] }
  0xf1   : > { %797 = vmatprep.subr.mxu0 %v720_v12 }
  0xf2   : > { %798 = vmatpush1.msra.mxu0 %v719_v13  ;;  %v978_v13 = vld [vmem:[%s1706_s9] sm:$0xff] }
  0xf3   : > { %1335 = vmatmul.mubr.msk.f32.vlgmr.msra.gmra.mxu0 %vm609_vm2, %v727_v14 }
  0xf4   : > { %837 = vmatprep.mubr.f32.mxu0 %v1421_v1 }
  0xf7   : > { %1336 = vmatmul.mubr.msk.f32.gmra.mxu0 %vm609_vm2, %v728_v15 }
  0xf8   : > { %843 = vmatprep.mubr.f32.mxu0 %v1421_v1 }
  0xfb   : > { %1337 = vmatmul.mubr.msk.f32.gmra.mxu0 %vm609_vm2, %v729_v16 }
  0xfc   : > { %849 = vmatprep.mubr.f32.mxu0 %v1421_v1 }
  0xff   : > { %1338 = vmatmul.mubr.msk.f32.gmra.mxu0 %vm609_vm2, %v730_v17 }
 0x1b3   : > { %v833_v19 = vpop.f32.mrf.mxu0 }
 0x1b4   : > { %v834_v47 = vadd.f32 %v833_v19, %v738_v43  ;;  %v980_v19 = vld [vmem:[%s1706_s9 + $0x10] sm:$0xff] }
 0x1b5   : > { %v835_v20 = vpop.f32.mrf.mxu0 }
 0x1b6   : > { %v836_v44 = vadd.f32 %v835_v20, %v738_v43  ;;  %v1622_v51 = vmax.f32 %v834_v47, 0.0  ;;  %v981_v20 = vld [vmem:[%s1706_s9 + $0x18] sm:$0xff] }
 0x1b7   : > { %v839_v22 = vpop.f32.mrf.mxu0 }
 0x1b8   : > { %v840_v23 = vadd.f32 %v839_v22, %v743_v21  ;;  %v1616_v48 = vmax.f32 %v836_v44, 0.0 }
 0x1b9   : > { %v841_v24 = vpop.f32.mrf.mxu0 }
 0x1ba   : > { %v842_v25 = vadd.f32 %v841_v24, %v743_v21  ;;  %v1596_v28 = vmax.f32 %v840_v23, 0.0  ;;  %v864_v52 = vadd.f32 %v1616_v48, %v1622_v51  ;;  %v881_v53 = vmax.f32 %v1622_v51, %v1616_v48 }
 0x1bb   : > { %v845_v27 = vpop.f32.mrf.mxu0 }
 0x1bc   : > { %v1598_v29 = vmax.f32 %v842_v25, 0.0  ;;  %v846_v30 = vadd.f32 %v845_v27, %v748_v26 }
 0x1bd   : > { %v847_v31 = vpop.f32.mrf.mxu0 }
 0x1be   : > { %v848_v32 = vadd.f32 %v847_v31, %v748_v26  ;;  %v867_v33 = vadd.f32 %v1598_v29, %v1596_v28  ;;  %v1602_v35 = vmax.f32 %v846_v30, 0.0  ;;  %v884_v49 = vmax.f32 %v1596_v28, %v1598_v29 }
 0x1bf   : > { %v851_v34 = vpop.f32.mrf.mxu0 }
 0x1c0   : > { %v1604_v36 = vmax.f32 %v848_v32, 0.0  ;;  %v852_v37 = vadd.f32 %v851_v34, %v753_v18  ;;  %868 = vadd.xlane.f32.xlu0 %v867_v33 }
 0x1c1   : > { %v853_v38 = vpop.f32.mrf.mxu0 }
 0x1c2   : > { %v854_v39 = vadd.f32 %v853_v38, %v753_v18  ;;  %v870_v40 = vadd.f32 %v1604_v36, %v1602_v35  ;;  %v1608_v41 = vmax.f32 %v852_v37, 0.0  ;;  %v887_v45 = vmax.f32 %v1602_v35, %v1604_v36  ;;  %v979_v18 = vld [vmem:[%s1706_s9 + $0x8] sm:$0xff] }
 0x1c4   : > { %v1610_v42 = vmax.f32 %v854_v39, 0.0  ;;  %871 = vadd.xlane.f32.xlu1 %v870_v40 }
 0x1c6   : > { %v873_v46 = vadd.f32 %v1610_v42, %v1608_v41  ;;  %v890_v50 = vmax.f32 %v1608_v41, %v1610_v42 }
 0x1c8   : > { %888 = vmax.xlane.f32.xlu1 %v887_v45  ;;  %874 = vadd.xlane.f32.xlu0 %v873_v46 }
 0x1cc   : > { %885 = vmax.xlane.f32.xlu1 %v884_v49  ;;  %891 = vmax.xlane.f32.xlu0 %v890_v50 }
 0x1d0   : > { %865 = vadd.xlane.f32.xlu0 %v864_v52 }
 0x1d4   : > { %882 = vmax.xlane.f32.xlu0 %v881_v53 }
 0x1dd   : > { %901 = vperm.xlu1 %1396, %v898_v54  }
 0x1e1   : > { %993 = vperm.xlu1 %1396, %v983_v55  }
 0x1e5   : > { %998 = vperm.xlu1 %1396, %v984_v56  }
 0x1ea   : > { %988 = vperm.xlu0 %1395, %v982_v57  }
 0x1ee   : > { %1003 = vperm.xlu0 %1395, %v985_v58  }
 0x249   : > { %v869_v59 = vpop.xlane.xlu0 %868 }
 0x24a   : > { %v878_v5 = vmul.f32 0.00390625, %v869_v59 }
 0x24d   : > { %v872_v60 = vpop.xlane.xlu1 %871 }
 0x24e   : > { %v879_v2 = vmul.f32 0.00390625, %v872_v60 }
 0x251   : > { %v889_v61 = vpop.xlane.xlu1 %888  ;;  %v875_v62 = vpop.xlane.xlu0 %874 }
 0x252   : > { %v880_v63 = vmul.f32 0.00390625, %v875_v62  ;;  %v895_v6 = vsel %vm462_vm1, %v879_v2, %v889_v61 }
 0x255   : > { %v892_v0 = vpop.xlane.xlu0 %891  ;;  %v886_v4 = vpop.xlane.xlu1 %885 }
 0x256   : > { %v896_v3 = vsel %vm462_vm1, %v880_v63, %v892_v0  ;;  %v894_v8 = vsel %vm462_vm1, %v878_v5, %v886_v4 }
 0x257   : > { %1366 = vmatpush3.msra.mxu1 %v896_v3 }
 0x258   : > { %1367 = vmatprep.subr.mxu1 %v1421_v1 }
 0x259   : > { %1368 = vmatpush3.msra.mxu1 %v895_v6  ;;  %v866_v7 = vpop.xlane.xlu0 %865  ;;  %v902_v14 = vpop.permute.xlu1 %901 }
 0x25a   : > { %1369 = vmatprep.subr.mxu1 %v1421_v1  ;;  %v877_v9 = vmul.f32 0.00390625, %v866_v7 }
 0x25b   : > { %1370 = vmatpush3.msra.mxu1 %v894_v8 }
 0x25c   : > { %1371 = vmatprep.subr.mxu1 %v1421_v1 }
 0x25d   : > { %v883_v10 = vpop.xlane.xlu0 %882  ;;  %v994_v22 = vpop.permute.xlu1 %993 }
 0x25e   : > { %v893_v12 = vsel %vm462_vm1, %v877_v9, %v883_v10 }
 0x25f   : > { %1372 = vmatpush3.msra.mxu1 %v893_v12 }
 0x260   : > { %1374 = vmatmul.mubr.msk.f32.vlgmr.msra.gmra.mxu1 %vm609_vm2, %v897_v11 }
 0x261   : > { %1378 = vmatprep.mubr.msk.f32.mxu1 %vm1006_vm4, %v978_v13  ;;  %v999_v34 = vpop.permute.xlu1 %998 }
 0x265   : > { %v989_v21 = vpop.permute.xlu0 %988 }
 0x269   : > { %v1004_v30 = vpop.permute.xlu0 %1003 }
 0x320   : > { %v973_v15 = vpop.f32.mrf.mxu1 }
 0x321   : > { %v974_v1 = vadd.f32 %v973_v15, %v902_v14 }
 0x322   : > { %v1375_v16 = vpop.f32.mrf.mxu1 }
 0x323   : > { %v977_v17 = vmax.f32 %v974_v1, 0.0 }
 0x325   : > { %1376 = vmatprep.subr.msk.mxu1 %vm1019_vm5, %v977_v17 }
 0x326   : > { %1377 = vmatpush3.msk.msra.mxu1 %vm1019_vm5, %v977_v17 }
 0x327   : > { %1379 = vmatmul.mubr.msk.f32.vlgmr.msra.gmra.mxu1 %vm1006_vm4, %v979_v18 }
 0x328   : > { %1381 = vmatprep.mubr.msk.f32.mxu1 %vm1006_vm4, %v980_v19 }
 0x32b   : > { %1382 = vmatmul.mubr.msk.f32.gmra.mxu1 %vm1006_vm4, %v981_v20 }
 0x3e7   : > { %v1380_v23 = vpop.f32.mrf.mxu1 }
 0x3e8   : > { %v1095_v24 = vadd.f32 %v1380_v23, %v994_v22 }
 0x3e9   : > { %v1089_v25 = vpop.f32.mrf.mxu1 }
 0x3ea   : > { %v1090_v26 = vadd.f32 %v1089_v25, %v989_v21  ;;  %v1111_v27 = vsel %vm1006_vm4, %v1095_v24, 0.0 }
 0x3eb   : > { %1112 = vadd.xlane.f32.xlu0 %v1111_v27  ;;  %v1383_v31 = vpop.f32.mrf.mxu1 }
 0x3ec   : > { %v1105_v32 = vadd.f32 %v1383_v31, %v1004_v30  ;;  %v1108_v33 = vsel %vm1006_vm4, %v1090_v26, 0.0 }
 0x3ed   : > { %v1099_v37 = vpop.f32.mrf.mxu1  ;;  %1109 = vadd.xlane.f32.xlu1 %v1108_v33 }
 0x3ee   : > { %v1100_v38 = vadd.f32 %v1099_v37, %v999_v34  ;;  %v1117_v40 = vsel %vm1006_vm4, %v1105_v32, 0.0 }
 0x3f0   : > { %v1114_v39 = vsel %vm1006_vm4, %v1100_v38, 0.0 }
 0x3f1   : > { %1115 = vadd.xlane.f32.xlu0 %v1114_v39  ;;  %1118 = vadd.xlane.f32.xlu1 %v1117_v40 }
 0x474   : > { %v1113_v43 = vpop.xlane.xlu0 %1112 }
 0x475   : > { %v1346_v44 = vmul.f32 -1.442695, %v1113_v43 }
 0x476   : > { %v1110_v45 = vpop.xlane.xlu1 %1109 }
 0x477   : > { %1397 = vpow2.f32 %v1346_v44  ;;  %v1345_v46 = vmul.f32 -1.442695, %v1110_v45 }
 0x479   : > { %1399 = vpow2.f32 %v1345_v46 }
 0x47a   : > { %v1119_v47 = vpop.xlane.xlu1 %1118  ;;  %v1116_v49 = vpop.xlane.xlu0 %1115 }
 0x47b   : > { %v1348_v50 = vmul.f32 -1.442695, %v1119_v47  ;;  %v1347_v52 = vmul.f32 -1.442695, %v1116_v49 }
 0x47d   : > { %1401 = vpow2.f32 %v1348_v50 }
 0x47e   : > { %1403 = vpow2.f32 %v1347_v52 }
 0x484   : > { %v1398_v53 = vpop.eup %1397 }
 0x485   : > { %v1133_v54 = vadd.f32 1.0, %v1398_v53 }
 0x486   : > { %v1400_v55 = vpop.eup %1399 }
 0x487   : > { %1405 = vrcp.f32 %v1133_v54  ;;  %v1132_v56 = vadd.f32 1.0, %v1400_v55 }
 0x489   : > { %1407 = vrcp.f32 %v1132_v56 }
 0x48a   : > { %v1402_v57 = vpop.eup %1401 }
 0x48b   : > { %v1404_v58 = vpop.eup %1403  ;;  %v1135_v59 = vadd.f32 1.0, %v1402_v57 }
 0x48c   : > { %v1134_v60 = vadd.f32 1.0, %v1404_v58 }
 0x48d   : > { %1409 = vrcp.f32 %v1135_v59 }
 0x48e   : > { %1411 = vrcp.f32 %v1134_v60 }
 0x494   : > { %v1406_v61 = vpop.eup %1405 }
 0x495   : > { %v1146_v62 = vmul.f32 %v1406_v61, %v1596_v28  ;;  %v1147_v63 = vmul.f32 %v1406_v61, %v1598_v29 }
 0x496   : > { %v1408_v0 = vpop.eup %1407 }
 0x497   : > { %1154 = vst [vmem:[%s438_s15 + $0x10] sm:$0xff] %v1146_v62  ;;  %1155 = vst [vmem:[%s438_s15 + $0x18] sm:$0xff] %v1147_v63  ;;  %v1144_v2 = vmul.f32 %v1408_v0, %v1622_v51  ;;  %v1145_v3 = vmul.f32 %v1408_v0, %v1616_v48 }
 0x499   : > { %1152 = vst [vmem:[%s438_s15] sm:$0xff] %v1144_v2  ;;  %1153 = vst [vmem:[%s438_s15 + $0x8] sm:$0xff] %v1145_v3  ;;  %v1178_v8 = vadd.f32 %v1146_v62, %v1144_v2  ;;  %v1187_v9 = vadd.f32 %v1147_v63, %v1145_v3 }
 0x49a   : > { %v1410_v4 = vpop.eup %1409 }
 0x49b   : > { %v1412_v5 = vpop.eup %1411  ;;  %v1150_v6 = vmul.f32 %v1410_v4, %v1608_v41  ;;  %v1151_v7 = vmul.f32 %v1410_v4, %v1610_v42 }
 0x49c   : > { %v1148_v28 = vmul.f32 %v1412_v5, %v1602_v35  ;;  %v1149_v29 = vmul.f32 %v1412_v5, %v1604_v36 }
 0x49d   : > { %1158 = vst [vmem:[%s438_s15 + $0x30] sm:$0xff] %v1150_v6  ;;  %1159 = vst [vmem:[%s438_s15 + $0x38] sm:$0xff] %v1151_v7  ;;  %v1161_v10 = vmax.f32 %v1146_v62, %v1150_v6  ;;  %v1170_v51 = vmax.f32 %v1147_v63, %v1151_v7 }
 0x49e   : > { %1156 = vst [vmem:[%s438_s15 + $0x20] sm:$0xff] %v1148_v28  ;;  %1157 = vst [vmem:[%s438_s15 + $0x28] sm:$0xff] %v1149_v29  ;;  %v1160_v48 = vmax.f32 %v1144_v2, %v1148_v28  ;;  %v1169_v11 = vmax.f32 %v1145_v3, %v1149_v29  ;;  %v1179_v12 = vadd.f32 %v1178_v8, %v1148_v28 }
 0x49f   : > { %v1188_v13 = vadd.f32 %v1187_v9, %v1149_v29 }
 0x4a0   : > { %v1162_v14 = vmax.f32 %v1160_v48, %v1161_v10  ;;  %v1171_v41 = vmax.f32 %v1169_v11, %v1170_v51  ;;  %v1180_v15 = vadd.f32 %v1179_v12, %v1150_v6 }
 0x4a1   : > { %v1189_v42 = vadd.f32 %v1188_v13, %v1151_v7 }
 0x4a2   : > { %v1163_v1 = vrot.slane %v1162_v14, 4  ;;  %v1172_v16 = vrot.slane %v1171_v41, 4  ;;  %v1181_v17 = vrot.slane %v1180_v15, 4 }
 0x4a3   : > { %v1190_v35 = vrot.slane %v1189_v42, 4 }
 0x4a4   : > { %v1164_v18 = vmax.f32 %v1162_v14, %v1163_v1  ;;  %v1173_v36 = vmax.f32 %v1171_v41, %v1172_v16  ;;  %v1182_v19 = vadd.f32 %v1181_v17, %v1180_v15 }
 0x4a5   : > { %v1191_v20 = vadd.f32 %v1190_v35, %v1189_v42 }
 0x4a6   : > { %v1165_v21 = vrot.slane %v1164_v18, 2  ;;  %v1174_v22 = vrot.slane %v1173_v36, 2  ;;  %v1183_v23 = vrot.slane %v1182_v19, 2 }
 0x4a7   : > { %v1192_v24 = vrot.slane %v1191_v20, 2 }
 0x4a8   : > { %v1166_v25 = vmax.f32 %v1164_v18, %v1165_v21  ;;  %v1175_v26 = vmax.f32 %v1173_v36, %v1174_v22  ;;  %v1184_v27 = vadd.f32 %v1183_v23, %v1182_v19 }
 0x4a9   : > { %v1193_v30 = vadd.f32 %v1192_v24, %v1191_v20 }
 0x4aa   : > { %v1167_v31 = vrot.slane %v1166_v25, 1  ;;  %v1176_v32 = vrot.slane %v1175_v26, 1  ;;  %v1185_v33 = vrot.slane %v1184_v27, 1 }
 0x4ab   : > { %v1194_v34 = vrot.slane %v1193_v30, 1 }
 0x4ac   : > { %v1186_v37 = vadd.f32 %v1185_v33, %v1184_v27  ;;  %v1168_v39 = vmax.f32 %v1166_v25, %v1167_v31  ;;  %v1177_v40 = vmax.f32 %v1175_v26, %v1176_v32 }
 0x4ad   : > { %v1195_v38 = vadd.f32 %v1194_v34, %v1193_v30 }
 0x4ae   : > { %v1197_v43 = vmul.f32 0.03125, %v1186_v37 }
 0x4af   : > { %v1198_v44 = vmul.f32 0.03125, %v1195_v38 }
 0x4b0   : > { %v1199_v45 = vsel %vm475_vm0, %v1168_v39, %v1197_v43 }
 0x4b1   : > { %v1200_v46 = vsel %vm475_vm0, %v1177_v40, %v1198_v44 }
 0x4b2   : > { %v1203_v47 = vcombine.low %v1199_v45, %v1200_v46 }
 0x4b4   : > { %1349 = vst.sshfl [vmem:[%s443_s18] sm:$0x33 pattern:$0x76325410] %v1203_v47 }
 0x4b5 PF: > { %s23_s21 = sadd.s32 1, %s1419_s21  }
 0x4b6   : > { %p20_p4 = scmp.ge.s32.totalorder %s23_s21, 4  }
 0x4b8   :  { %22 = sbr.rel (!%p20_p4) target bundleno = 1 (0x1), region = 109 }

// kernel: _lambda_.9
= control target key start
LH: loop header
LB: loop body
LE: loop exit
PB: predicated region body
PF: predicated region fallthrough
CT: control target
= control target key end

     0   :  { %s696_s21 = smov 0   ;;  %s744_s0 = inlined_call_operand.vmem [shape: f32[2,32,256], index: 0, kind: input, shape index: {}]   ;;  %s745_s1 = inlined_call_operand.vmem [shape: f32[2,1,256], index: 1, kind: input, shape index: {}]   ;;  %s746_s2 = inlined_call_operand.vmem [shape: f32[2,3,256], index: 2, kind: input, shape index: {}]   ;;  %s747_s3 = inlined_call_operand.vmem [shape: f32[6,32], index: 3, kind: input, shape index: {}]   ;;  %s748_s4 = inlined_call_operand.vmem [shape: f32[6,1], index: 4, kind: input, shape index: {}]   ;;  %s749_s5 = inlined_call_operand.vmem [shape: f32[2,3,256], index: 5, kind: output, shape index: {0}]   ;;  %s750_s6 = inlined_call_operand.vmem [shape: f32[2,1,256], index: 6, kind: output, shape index: {1}]  }
   0x1 LB: > { %s604_s22 = sadd.s32 4294967295, %s656_s21   ;;  %p608_p0 = scmp.ge.s32.totalorder %s656_s21, 1  ;;  %s656_s21 = sphi %s696_s21, %s17_s21  }
   0x2   : > { %p234_p1 = scmp.lt.s32.totalorder %s656_s21, 3 }
   0x4   : > { %p235_p2 = pnand %p608_p0, %p234_p1 }
   0x5   : > { %p277_p3 = scmp.lt.s32.totalorder (!%p235_p2), %s604_s22, 1 }
   0x6   : > { %238 = sbr.rel (%p235_p2) target bundleno = 300 (0x12c), region = 40 }
   0xb   : > { %v310_v0 = vlaneseq  ;;  %v658_v1 = vmov 0.0   ;;  %v329_v2 = vld [vmem:[%s748_s4] sm:$0x3f]  ;;  %s752_s22 = smov (!%p277_p3, %s604_s22), 1  ;;  %v659_v4 = vmov 0   ;;  %vm335_vm0 = vcmask 261120  }
   0xc   : > { %403 = vmatprep.mubr.f32.mxu0 %v658_v1  ;;  %637 = vset.pattern.permute.xlu0 %v659_v4  ;;  %s623_s25 = sshll.u32 %s752_s22, 6  ;;  %s611_s26 = sshll.u32 %s752_s22, 1  ;;  %v328_v26 = vld [vmem:[%s747_s3] sm:$0x3f]  ;;  %vm436_vm1 = vcmask 1040384   ;;  %vm437_vm2 = vcmask 1044484  }
   0xd   : > { %v710_v3 = vshrl.u32 %v310_v0, 7  ;;  %332 = vperm.xlu0 %637, %v329_v2   ;;  %s281_s29 = scalar_lea.vmem %s744_s0, %s623_s25  ;;  %s285_s8 = scalar_lea.vmem %s745_s1, %s611_s26  ;;  %vm438_vm3 = vmor %vm436_vm1, %vm437_vm2  ;;  %vm456_vm4 = vcmask 1042432   ;;  %v660_v1 = vmov 1966171168   ;;  %vm491_vm5 = vcmp.lt.s32.totalorder %v310_v0, 256 }
   0xe   : > { %v307_v7 = vld [vmem:[%s281_s29 + $0x38] sm:$0xff]  ;;  %v308_v8 = vld [vmem:[%s285_s8] sm:$0x3]  ;;  %v306_v9 = vld [vmem:[%s281_s29 + $0x30] sm:$0xff]  ;;  %s624_s11 = sshll.u32 %s752_s22, 3  ;;  %v475_v2 = vunpack.c.l.s4 %v660_v1  ;;  %s299_s20 = scalar_lea.vmem %s750_s6, %s611_s26 }
   0xf   : > { %v316_v5 = vsub.s32 1, %v710_v3  ;;  %v312_v6 = vsub.s32 0, %v710_v3  ;;  %v305_v12 = vld [vmem:[%s281_s29 + $0x28] sm:$0xff]  ;;  %v304_v13 = vld [vmem:[%s281_s29 + $0x20] sm:$0xff]  ;;  %v303_v14 = vld [vmem:[%s281_s29 + $0x18] sm:$0xff]  ;;  %s290_s14 = scalar_lea.vmem %s746_s2, %s624_s11  ;;  %s295_s17 = scalar_lea.vmem %s749_s5, %s624_s11 }
  0x10   : > { %v302_v18 = vld [vmem:[%s281_s29 + $0x10] sm:$0xff]  ;;  %v301_v20 = vld [vmem:[%s281_s29 + $0x8] sm:$0xff]  ;;  %v300_v22 = vld [vmem:[%s281_s29] sm:$0xff] }
  0x11   : > { %v317_v10 = vrot.slane %v308_v8, %v316_v5  ;;  %v313_v11 = vrot.slane %v308_v8, %v312_v6  ;;  %v426_v45 = vld [vmem:[%s290_s14] sm:$0x77]  ;;  %v476_v8 = vunpack.c.0.s8 %v475_v2 }
  0x13   : > { %v327_v15 = vmul.f32 %v317_v10, %v307_v7  ;;  %v326_v16 = vmul.f32 %v313_v11, %v306_v9  ;;  %v325_v17 = vmul.f32 %v317_v10, %v305_v12  ;;  %v324_v19 = vmul.f32 %v313_v11, %v304_v13 }
  0x14   : > { %v323_v21 = vmul.f32 %v317_v10, %v303_v14  ;;  %v322_v23 = vmul.f32 %v313_v11, %v302_v18  ;;  %v321_v24 = vmul.f32 %v317_v10, %v301_v20  ;;  %v320_v25 = vmul.f32 %v313_v11, %v300_v22 }
  0x15   : > { %363 = vmatprep.subr.mxu0 %v327_v15  ;;  %v479_v12 = vsub.s32 %v476_v8, %v710_v3 }
  0x16   : > { %364 = vmatpush1.msra.mxu0 %v326_v16 }
  0x17   : > { %365 = vmatprep.subr.mxu0 %v325_v17 }
  0x18   : > { %366 = vmatpush1.msra.mxu0 %v324_v19 }
  0x19   : > { %367 = vmatprep.subr.mxu0 %v323_v21 }
  0x1a   : > { %368 = vmatpush1.msra.mxu0 %v322_v23 }
  0x1b   : > { %369 = vmatprep.subr.mxu0 %v321_v24 }
  0x1c   : > { %370 = vmatpush1.msra.mxu0 %v320_v25 }
  0x1d   : > { %617 = vmatmul.mubr.msk.f32.vlgmr.msra.gmra.mxu0 %vm335_vm0, %v328_v26 }
  0x88   : > { %v333_v27 = vpop.permute.xlu0 %332 }
  0xdd   : > { %v405_v28 = vpop.f32.mrf.mxu0 }
  0xde   : > { %v406_v29 = vadd.f32 %v405_v28, %v333_v27 }
  0xdf   : > { %v407_v30 = vpop.f32.mrf.mxu0 }
  0xe0   : > { %v410_v31 = vadd.f32 2.0, %v406_v29  ;;  %v408_v32 = vadd.f32 %v407_v30, %v333_v27 }
  0xe2   : > { %v618_v33 = vmul.f32 -1.442695, %v410_v31  ;;  %v411_v34 = vadd.f32 2.0, %v408_v32  ;;  %v429_v44 = vcombine.low %v406_v29, %v408_v32 }
  0xe4   : > { %638 = vpow2.f32 %v618_v33  ;;  %v619_v35 = vmul.f32 -1.442695, %v411_v34  ;;  %v431_v50 = vadd.f32 %v429_v44, %v426_v45 }
  0xe6   : > { %640 = vpow2.f32 %v619_v35 }
  0xf1   : > { %v639_v36 = vpop.eup %638 }
  0xf2   : > { %v418_v37 = vadd.f32 1.0, %v639_v36 }
  0xf3   : > { %v641_v38 = vpop.eup %640 }
  0xf4   : > { %642 = vrcp.f32 %v418_v37  ;;  %v419_v39 = vadd.f32 1.0, %v641_v38 }
  0xf6   : > { %644 = vrcp.f32 %v419_v39 }
 0x101   : > { %v643_v40 = vpop.eup %642 }
 0x102   : > { %v424_v41 = vadd.f32 0.0001, %v643_v40 }
 0x103   : > { %v645_v42 = vpop.eup %644 }
 0x104   : > { %646 = vlog2.f32 %v424_v41  ;;  %v425_v43 = vadd.f32 0.0001, %v645_v42 }
 0x106   : > { %v434_v46 = vcombine.low %v424_v41, %v425_v43  ;;  %v435_v47 = vcombine.high %v424_v41, %v425_v43  ;;  %648 = vlog2.f32 %v425_v43 }
 0x108   : > { %v620_v48 = vrot.slane %v434_v46, 11  ;;  %v441_v49 = vrot.slane %v435_v47, 7 }
 0x10a   : > { %v442_v51 = vsel %vm438_vm3, %v620_v48, %v441_v49 }
 0x10b   : > { %v444_v52 = vmul.f32 %v442_v51, %v431_v50 }
 0x10d   : > { %445 = vst [vmem:[%s295_s17] sm:$0x77] %v444_v52 }
 0x111   : > { %v647_v53 = vpop.eup %646 }
 0x112   : > { %v447_v54 = vmul.f32 0.6931472, %v647_v53 }
 0x113   : > { %v649_v55 = vpop.eup %648 }
 0x114   : > { %v452_v56 = vrot.slane %v447_v54, 3  ;;  %v449_v57 = vmul.f32 0.6931472, %v649_v55 }
 0x116   : > { %v457_v58 = vsel %vm456_vm4, %v452_v56, 0.0  ;;  %v453_v59 = vrot.slane %v449_v57, 3 }
 0x117   : > { %v458_v60 = vrot.slane %v457_v58, 4 }
 0x118   : > { %v464_v61 = vsel %vm456_vm4, %v453_v59, 0.0 }
 0x119   : > { %v459_v62 = vadd.f32 %v458_v60, %v457_v58  ;;  %v465_v63 = vrot.slane %v464_v61, 4 }
 0x11b   : > { %v460_v4 = vrot.slane %v459_v62, 2  ;;  %v466_v5 = vadd.f32 %v465_v63, %v464_v61 }
 0x11d   : > { %v461_v6 = vadd.f32 %v460_v4, %v459_v62  ;;  %v467_v7 = vrot.slane %v466_v5, 2 }
 0x11f   : > { %v462_v9 = vrot.slane %v461_v6, 1  ;;  %v468_v10 = vadd.f32 %v467_v7, %v466_v5 }
 0x121   : > { %v469_v11 = vrot.slane %v468_v10, 1  ;;  %v463_v13 = vadd.f32 %v462_v9, %v461_v6 }
 0x123   : > { %v470_v14 = vadd.f32 %v469_v11, %v468_v10 }
 0x125   : > { %v473_v15 = vcombine.low %v463_v13, %v470_v14 }
 0x127   : > { %v480_v16 = vrot.slane %v473_v15, %v479_v12 }
 0x129   : > { %v487_v17 = vrot.slane %v480_v16, %v479_v12 }
 0x12b   : > { %493 = vst.msk [vmem:[%s299_s20] sm:$0x3] %vm491_vm5, %v487_v17 }
 0x12c PF: > { %s17_s21 = sadd.s32 1, %s656_s21  }
 0x12d   : > { %p14_p4 = scmp.ge.s32.totalorder %s17_s21, 4  }
 0x12f   :  { %16 = sbr.rel (!%p14_p4) target bundleno = 1 (0x1), region = 88 }

</bundles_post_ra>
